<compile_context>
chip_gen: v7x
topology: tpu7x:2x2x1
jax: 0.10.0
libtpu: 0.0.40
codegen_flags: <defaults>
</compile_context>

<pallas_src>
import jax
import jax.numpy as jnp
from jax.experimental import pallas as pl
from jax.experimental.pallas import tpu as pltpu

# ----- sizes (small, consistent with the module's reshape to (-1, 128, 16)) -----
N_IMGS = 8
N_CLASSES = 4
CONTENT_DIM = 128 * 16          # 2048 -> reshaped to (128, 16)
CLASS_DIM = 128
IMG_C, IMG_H, IMG_W = 3, 16, 16
HIDDEN = 256
OUT_DIM = IMG_C * IMG_H * IMG_W  # 768
BATCH = 2
B_PAD = 8                        # f32 sublane alignment for the M dimension


# ===================== fused gather + split-K MLP decoder =====================
def _fused_kernel(img_ids_ref, class_ids_ref,            # SMEM scalar prefetch
                  content_tbl_ref, class_tbl_ref,        # VMEM-resident tables
                  w1c_ref, w1k_ref, b1_ref, w2_ref, b2_ref,
                  img_out_ref, content_out_ref, class_out_ref):
    # ---- embedding gathers: data-dependent row picks from VMEM tables ----
    content_rows = [content_tbl_ref[pl.ds(img_ids_ref[i], 1), :]
                    for i in range(B_PAD)]
    class_rows = [class_tbl_ref[pl.ds(class_ids_ref[i], 1), :]
                  for i in range(B_PAD)]
    content = jnp.concatenate(content_rows, axis=0)       # (B_PAD, 2048) f32
    cls = jnp.concatenate(class_rows, axis=0)             # (B_PAD, 128)  f32

    # full-block (unmasked) stores of the latent codes
    content_out_ref[...] = content
    class_out_ref[...] = cls

    # ---- decoder MLP, split-K (no concat), bf16 MXU feed, f32 accumulate ----
    h = jnp.dot(content.astype(jnp.bfloat16), w1c_ref[...],
                preferred_element_type=jnp.float32)
    h = h + jnp.dot(cls.astype(jnp.bfloat16), w1k_ref[...],
                    preferred_element_type=jnp.float32)
    h = jnp.maximum(h + b1_ref[...], 0.0)                 # bias + ReLU (VPU)
    o = jnp.dot(h.astype(jnp.bfloat16), w2_ref[...],
                preferred_element_type=jnp.float32) + b2_ref[...]
    img_out_ref[...] = jnp.tanh(o)                        # tanh epilogue (EUP)


def latent_model_forward(params, img_id, class_id):
    B = img_id.shape[0]
    # pad id vectors to B_PAD with index 0 (padding rows are sliced off below)
    img_ids_p = jnp.zeros((B_PAD,), jnp.int32).at[:B].set(img_id.astype(jnp.int32))
    class_ids_p = jnp.zeros((B_PAD,), jnp.int32).at[:B].set(class_id.astype(jnp.int32))

    def full(shape):
        # single grid step; every operand is one full-array block in VMEM
        return pl.BlockSpec(shape, lambda i, img_ids, class_ids: (0, 0))

    img_flat, content_flat, class_code = pl.pallas_call(
        _fused_kernel,
        out_shape=(
            jax.ShapeDtypeStruct((B_PAD, OUT_DIM), jnp.float32),
            jax.ShapeDtypeStruct((B_PAD, CONTENT_DIM), jnp.float32),
            jax.ShapeDtypeStruct((B_PAD, CLASS_DIM), jnp.float32),
        ),
        grid_spec=pltpu.PrefetchScalarGridSpec(
            num_scalar_prefetch=2,
            grid=(1,),
            in_specs=[
                full((N_IMGS, CONTENT_DIM)),     # content embedding table (f32)
                full((N_CLASSES, CLASS_DIM)),    # class embedding table   (f32)
                full((CONTENT_DIM, HIDDEN)),     # W1 content leg (bf16)
                full((CLASS_DIM, HIDDEN)),       # W1 class leg   (bf16)
                full((1, HIDDEN)),               # b1 (f32)
                full((HIDDEN, OUT_DIM)),         # W2 (bf16)
                full((1, OUT_DIM)),              # b2 (f32)
            ],
            out_specs=(
                full((B_PAD, OUT_DIM)),
                full((B_PAD, CONTENT_DIM)),
                full((B_PAD, CLASS_DIM)),
            ),
        ),
        compiler_params=pltpu.CompilerParams(
            dimension_semantics=("arbitrary",)),
    )(img_ids_p, class_ids_p,
      params["content_emb"], params["class_emb"],
      params["w1c"], params["w1k"], params["b1"],
      params["w2"], params["b2"])

    generated_img = img_flat[:B].reshape((B, IMG_C, IMG_H, IMG_W))   # NCHW
    content_code = content_flat[:B].reshape((B, 128, 16))
    class_code = class_code[:B]
    return generated_img, content_code, class_code


# ============ parameter init (deterministic, mirrors weights_init) ============
def init_params(key):
    k_cont, k_cls, k_w1, k_w2 = jax.random.split(key, 4)
    # synthetic decoder weights; W1 is split into content/class legs (no concat)
    w1 = 0.02 * jax.random.normal(
        k_w1, (CONTENT_DIM + CLASS_DIM, HIDDEN), jnp.float32)
    w2 = 0.02 * jax.random.normal(k_w2, (HIDDEN, OUT_DIM), jnp.float32)
    return {
        # nn.init.uniform_(weight, a=-0.05, b=0.05) for nn.Embedding (kept f32)
        "content_emb": jax.random.uniform(
            k_cont, (N_IMGS, CONTENT_DIM), jnp.float32, -0.05, 0.05),
        "class_emb": jax.random.uniform(
            k_cls, (N_CLASSES, CLASS_DIM), jnp.float32, -0.05, 0.05),
        "w1c": w1[:CONTENT_DIM].astype(jnp.bfloat16),
        "w1k": w1[CONTENT_DIM:].astype(jnp.bfloat16),
        "b1": jnp.zeros((1, HIDDEN), jnp.float32),
        "w2": w2.astype(jnp.bfloat16),
        "b2": jnp.zeros((1, OUT_DIM), jnp.float32),
    }


if __name__ == "__main__":
    key = jax.random.PRNGKey(0)
    k_param, k_img, k_cls = jax.random.split(key, 3)

    params = init_params(k_param)
    img_id = jax.random.randint(k_img, (BATCH,), 0, N_IMGS, dtype=jnp.int32)
    class_id = jax.random.randint(k_cls, (BATCH,), 0, N_CLASSES, dtype=jnp.int32)

    fwd = jax.jit(latent_model_forward)
    gen, content_code, class_code = fwd(params, img_id, class_id)
    jax.block_until_ready((gen, content_code, class_code))

    assert gen.shape == (BATCH, IMG_C, IMG_H, IMG_W)
    assert content_code.shape == (BATCH, 128, 16)
    assert class_code.shape == (BATCH, CLASS_DIM)
    assert bool(jnp.all(jnp.isfinite(gen)))

    # sanity: gathered rows are exact copies of the f32 embedding table rows
    assert jnp.allclose(
        content_code.reshape(BATCH, -1), params["content_emb"][img_id])
    assert jnp.allclose(class_code, params["class_emb"][class_id])

    print("KERNEL_OK")
</pallas_src>

<mosaic_0001>
module attributes {stable_mosaic.version = 11 : i64} {
  func.func @_fused_kernel(%arg0: i32, %arg1: memref<8xi32, #tpu.memory_space<smem>>, %arg2: memref<8xi32, #tpu.memory_space<smem>>, %arg3: memref<8x2048xf32, #tpu.memory_space<vmem>>, %arg4: memref<4x128xf32, #tpu.memory_space<vmem>>, %arg5: memref<2048x256xbf16, #tpu.memory_space<vmem>>, %arg6: memref<128x256xbf16, #tpu.memory_space<vmem>>, %arg7: memref<1x256xf32, #tpu.memory_space<vmem>>, %arg8: memref<256x768xbf16, #tpu.memory_space<vmem>>, %arg9: memref<1x768xf32, #tpu.memory_space<vmem>>, %arg10: memref<8x768xf32, #tpu.memory_space<vmem>>, %arg11: memref<8x2048xf32, #tpu.memory_space<vmem>>, %arg12: memref<8x128xf32, #tpu.memory_space<vmem>>) attributes {dimension_semantics = [#tpu.dimension_semantics<arbitrary>], iteration_bounds = array<i64: 1>, scalar_prefetch = 2 : i64, scratch_operands = 0 : i64, tpu.core_type = #tpu.core_type<tc>, window_params = [{pipeline_mode = #tpu.pipeline_mode<synchronous>, transform_indices = @transform_0, window_bounds = array<i64: 8, 2048>}, {pipeline_mode = #tpu.pipeline_mode<synchronous>, transform_indices = @transform_1, window_bounds = array<i64: 4, 128>}, {pipeline_mode = #tpu.pipeline_mode<synchronous>, transform_indices = @transform_2, window_bounds = array<i64: 2048, 256>}, {pipeline_mode = #tpu.pipeline_mode<synchronous>, transform_indices = @transform_3, window_bounds = array<i64: 128, 256>}, {pipeline_mode = #tpu.pipeline_mode<synchronous>, transform_indices = @transform_4, window_bounds = array<i64: 1, 256>}, {pipeline_mode = #tpu.pipeline_mode<synchronous>, transform_indices = @transform_5, window_bounds = array<i64: 256, 768>}, {pipeline_mode = #tpu.pipeline_mode<synchronous>, transform_indices = @transform_6, window_bounds = array<i64: 1, 768>}, {pipeline_mode = #tpu.pipeline_mode<synchronous>, transform_indices = @transform_7, window_bounds = array<i64: 8, 768>}, {pipeline_mode = #tpu.pipeline_mode<synchronous>, transform_indices = @transform_8, window_bounds = array<i64: 8, 2048>}, {pipeline_mode = #tpu.pipeline_mode<synchronous>, transform_indices = @transform_9, window_bounds = array<i64: 8, 128>}]} {
    %c0 = arith.constant 0 : index
    %0 = memref.load %arg1[%c0] : memref<8xi32, #tpu.memory_space<smem>>
    %1 = arith.index_cast %0 : i32 to index
    %c0_0 = arith.constant 0 : index
    %2 = vector.load %arg3[%1, %c0_0] : memref<8x2048xf32, #tpu.memory_space<vmem>>, vector<1x2048xf32>
    %c1 = arith.constant 1 : index
    %3 = memref.load %arg1[%c1] : memref<8xi32, #tpu.memory_space<smem>>
    %4 = arith.index_cast %3 : i32 to index
    %c0_1 = arith.constant 0 : index
    %5 = vector.load %arg3[%4, %c0_1] : memref<8x2048xf32, #tpu.memory_space<vmem>>, vector<1x2048xf32>
    %c2 = arith.constant 2 : index
    %6 = memref.load %arg1[%c2] : memref<8xi32, #tpu.memory_space<smem>>
    %7 = arith.index_cast %6 : i32 to index
    %c0_2 = arith.constant 0 : index
    %8 = vector.load %arg3[%7, %c0_2] : memref<8x2048xf32, #tpu.memory_space<vmem>>, vector<1x2048xf32>
    %c3 = arith.constant 3 : index
    %9 = memref.load %arg1[%c3] : memref<8xi32, #tpu.memory_space<smem>>
    %10 = arith.index_cast %9 : i32 to index
    %c0_3 = arith.constant 0 : index
    %11 = vector.load %arg3[%10, %c0_3] : memref<8x2048xf32, #tpu.memory_space<vmem>>, vector<1x2048xf32>
    %c4 = arith.constant 4 : index
    %12 = memref.load %arg1[%c4] : memref<8xi32, #tpu.memory_space<smem>>
    %13 = arith.index_cast %12 : i32 to index
    %c0_4 = arith.constant 0 : index
    %14 = vector.load %arg3[%13, %c0_4] : memref<8x2048xf32, #tpu.memory_space<vmem>>, vector<1x2048xf32>
    %c5 = arith.constant 5 : index
    %15 = memref.load %arg1[%c5] : memref<8xi32, #tpu.memory_space<smem>>
    %16 = arith.index_cast %15 : i32 to index
    %c0_5 = arith.constant 0 : index
    %17 = vector.load %arg3[%16, %c0_5] : memref<8x2048xf32, #tpu.memory_space<vmem>>, vector<1x2048xf32>
    %c6 = arith.constant 6 : index
    %18 = memref.load %arg1[%c6] : memref<8xi32, #tpu.memory_space<smem>>
    %19 = arith.index_cast %18 : i32 to index
    %c0_6 = arith.constant 0 : index
    %20 = vector.load %arg3[%19, %c0_6] : memref<8x2048xf32, #tpu.memory_space<vmem>>, vector<1x2048xf32>
    %c7 = arith.constant 7 : index
    %21 = memref.load %arg1[%c7] : memref<8xi32, #tpu.memory_space<smem>>
    %22 = arith.index_cast %21 : i32 to index
    %c0_7 = arith.constant 0 : index
    %23 = vector.load %arg3[%22, %c0_7] : memref<8x2048xf32, #tpu.memory_space<vmem>>, vector<1x2048xf32>
    %c0_8 = arith.constant 0 : index
    %24 = memref.load %arg2[%c0_8] : memref<8xi32, #tpu.memory_space<smem>>
    %25 = arith.index_cast %24 : i32 to index
    %c0_9 = arith.constant 0 : index
    %26 = vector.load %arg4[%25, %c0_9] : memref<4x128xf32, #tpu.memory_space<vmem>>, vector<1x128xf32>
    %c1_10 = arith.constant 1 : index
    %27 = memref.load %arg2[%c1_10] : memref<8xi32, #tpu.memory_space<smem>>
    %28 = arith.index_cast %27 : i32 to index
    %c0_11 = arith.constant 0 : index
    %29 = vector.load %arg4[%28, %c0_11] : memref<4x128xf32, #tpu.memory_space<vmem>>, vector<1x128xf32>
    %c2_12 = arith.constant 2 : index
    %30 = memref.load %arg2[%c2_12] : memref<8xi32, #tpu.memory_space<smem>>
    %31 = arith.index_cast %30 : i32 to index
    %c0_13 = arith.constant 0 : index
    %32 = vector.load %arg4[%31, %c0_13] : memref<4x128xf32, #tpu.memory_space<vmem>>, vector<1x128xf32>
    %c3_14 = arith.constant 3 : index
    %33 = memref.load %arg2[%c3_14] : memref<8xi32, #tpu.memory_space<smem>>
    %34 = arith.index_cast %33 : i32 to index
    %c0_15 = arith.constant 0 : index
    %35 = vector.load %arg4[%34, %c0_15] : memref<4x128xf32, #tpu.memory_space<vmem>>, vector<1x128xf32>
    %c4_16 = arith.constant 4 : index
    %36 = memref.load %arg2[%c4_16] : memref<8xi32, #tpu.memory_space<smem>>
    %37 = arith.index_cast %36 : i32 to index
    %c0_17 = arith.constant 0 : index
    %38 = vector.load %arg4[%37, %c0_17] : memref<4x128xf32, #tpu.memory_space<vmem>>, vector<1x128xf32>
    %c5_18 = arith.constant 5 : index
    %39 = memref.load %arg2[%c5_18] : memref<8xi32, #tpu.memory_space<smem>>
    %40 = arith.index_cast %39 : i32 to index
    %c0_19 = arith.constant 0 : index
    %41 = vector.load %arg4[%40, %c0_19] : memref<4x128xf32, #tpu.memory_space<vmem>>, vector<1x128xf32>
    %c6_20 = arith.constant 6 : index
    %42 = memref.load %arg2[%c6_20] : memref<8xi32, #tpu.memory_space<smem>>
    %43 = arith.index_cast %42 : i32 to index
    %c0_21 = arith.constant 0 : index
    %44 = vector.load %arg4[%43, %c0_21] : memref<4x128xf32, #tpu.memory_space<vmem>>, vector<1x128xf32>
    %c7_22 = arith.constant 7 : index
    %45 = memref.load %arg2[%c7_22] : memref<8xi32, #tpu.memory_space<smem>>
    %46 = arith.index_cast %45 : i32 to index
    %c0_23 = arith.constant 0 : index
    %47 = vector.load %arg4[%46, %c0_23] : memref<4x128xf32, #tpu.memory_space<vmem>>, vector<1x128xf32>
    %48 = tpu.concatenate %2, %5, %8, %11, %14, %17, %20, %23 in 0 : vector<1x2048xf32>, vector<1x2048xf32>, vector<1x2048xf32>, vector<1x2048xf32>, vector<1x2048xf32>, vector<1x2048xf32>, vector<1x2048xf32>, vector<1x2048xf32> -> vector<8x2048xf32>
    %49 = tpu.concatenate %26, %29, %32, %35, %38, %41, %44, %47 in 0 : vector<1x128xf32>, vector<1x128xf32>, vector<1x128xf32>, vector<1x128xf32>, vector<1x128xf32>, vector<1x128xf32>, vector<1x128xf32>, vector<1x128xf32> -> vector<8x128xf32>
    %c0_24 = arith.constant 0 : index
    %c0_25 = arith.constant 0 : index
    %50 = vector.load %arg11[%c0_24, %c0_25] : memref<8x2048xf32, #tpu.memory_space<vmem>>, vector<8x2048xf32>
    tpu.vector_store %arg11[%c0_24, %c0_25], %48 {strides = array<i32>} : memref<8x2048xf32, #tpu.memory_space<vmem>>, vector<8x2048xf32>,
    %c0_26 = arith.constant 0 : index
    %c0_27 = arith.constant 0 : index
    %51 = vector.load %arg12[%c0_26, %c0_27] : memref<8x128xf32, #tpu.memory_space<vmem>>, vector<8x128xf32>
    tpu.vector_store %arg12[%c0_26, %c0_27], %49 {strides = array<i32>} : memref<8x128xf32, #tpu.memory_space<vmem>>, vector<8x128xf32>,
    %52 = arith.truncf %48 : vector<8x2048xf32> to vector<8x2048xbf16>
    %c0_28 = arith.constant 0 : index
    %c0_29 = arith.constant 0 : index
    %53 = vector.load %arg5[%c0_28, %c0_29] : memref<2048x256xbf16, #tpu.memory_space<vmem>>, vector<2048x256xbf16>
    %cst = arith.constant dense<0.000000e+00> : vector<8x256xf32>
    %54 = tpu.matmul %52, %53, %cst {dimension_numbers = #tpu.dot_dimension_numbers<[1], [0], [0], [1], [0, 0, 1, 1], [], []>} : vector<8x2048xbf16>, vector<2048x256xbf16>, vector<8x256xf32> -> vector<8x256xf32>
    %55 = arith.truncf %49 : vector<8x128xf32> to vector<8x128xbf16>
    %c0_30 = arith.constant 0 : index
    %c0_31 = arith.constant 0 : index
    %56 = vector.load %arg6[%c0_30, %c0_31] : memref<128x256xbf16, #tpu.memory_space<vmem>>, vector<128x256xbf16>
    %cst_32 = arith.constant dense<0.000000e+00> : vector<8x256xf32>
    %57 = tpu.matmul %55, %56, %cst_32 {dimension_numbers = #tpu.dot_dimension_numbers<[1], [0], [0], [1], [0, 0, 1, 1], [], []>} : vector<8x128xbf16>, vector<128x256xbf16>, vector<8x256xf32> -> vector<8x256xf32>
    %58 = arith.addf %54, %57 : vector<8x256xf32>
    %c0_33 = arith.constant 0 : index
    %c0_34 = arith.constant 0 : index
    %59 = vector.load %arg7[%c0_33, %c0_34] : memref<1x256xf32, #tpu.memory_space<vmem>>, vector<1x256xf32>
    %60 = vector.broadcast %59 : vector<1x256xf32> to vector<8x256xf32>
    %61 = arith.addf %58, %60 : vector<8x256xf32>
    %cst_35 = arith.constant 0.000000e+00 : f32
    %62 = vector.broadcast %cst_35 : f32 to vector<8x256xf32>
    %63 = arith.maximumf %61, %62 : vector<8x256xf32>
    %64 = arith.truncf %63 : vector<8x256xf32> to vector<8x256xbf16>
    %c0_36 = arith.constant 0 : index
    %c0_37 = arith.constant 0 : index
    %65 = vector.load %arg8[%c0_36, %c0_37] : memref<256x768xbf16, #tpu.memory_space<vmem>>, vector<256x768xbf16>
    %cst_38 = arith.constant dense<0.000000e+00> : vector<8x768xf32>
    %66 = tpu.matmul %64, %65, %cst_38 {dimension_numbers = #tpu.dot_dimension_numbers<[1], [0], [0], [1], [0, 0, 1, 1], [], []>} : vector<8x256xbf16>, vector<256x768xbf16>, vector<8x768xf32> -> vector<8x768xf32>
    %c0_39 = arith.constant 0 : index
    %c0_40 = arith.constant 0 : index
    %67 = vector.load %arg9[%c0_39, %c0_40] : memref<1x768xf32, #tpu.memory_space<vmem>>, vector<1x768xf32>
    %68 = vector.broadcast %67 : vector<1x768xf32> to vector<8x768xf32>
    %69 = arith.addf %66, %68 : vector<8x768xf32>
    %70 = math.tanh %69 : vector<8x768xf32>
    %c0_41 = arith.constant 0 : index
    %c0_42 = arith.constant 0 : index
    %71 = vector.load %arg10[%c0_41, %c0_42] : memref<8x768xf32, #tpu.memory_space<vmem>>, vector<8x768xf32>
    tpu.vector_store %arg10[%c0_41, %c0_42], %70 {strides = array<i32>} : memref<8x768xf32, #tpu.memory_space<vmem>>, vector<8x768xf32>,
    return
  }
  func.func @transform_0(%arg0: i32, %arg1: memref<8xi32, #tpu.memory_space<smem>>, %arg2: memref<8xi32, #tpu.memory_space<smem>>) -> (i32, i32) {
    %c0_i32 = arith.constant 0 : i32
    %c0_i32_0 = arith.constant 0 : i32
    %c0_i32_1 = arith.constant 0 : i32
    return %c0_i32, %c0_i32_0 : i32, i32
  }
  func.func @transform_1(%arg0: i32, %arg1: memref<8xi32, #tpu.memory_space<smem>>, %arg2: memref<8xi32, #tpu.memory_space<smem>>) -> (i32, i32) {
    %c0_i32 = arith.constant 0 : i32
    %c0_i32_0 = arith.constant 0 : i32
    %c0_i32_1 = arith.constant 0 : i32
    return %c0_i32, %c0_i32_0 : i32, i32
  }
  func.func @transform_2(%arg0: i32, %arg1: memref<8xi32, #tpu.memory_space<smem>>, %arg2: memref<8xi32, #tpu.memory_space<smem>>) -> (i32, i32) {
    %c0_i32 = arith.constant 0 : i32
    %c0_i32_0 = arith.constant 0 : i32
    %c0_i32_1 = arith.constant 0 : i32
    return %c0_i32, %c0_i32_0 : i32, i32
  }
  func.func @transform_3(%arg0: i32, %arg1: memref<8xi32, #tpu.memory_space<smem>>, %arg2: memref<8xi32, #tpu.memory_space<smem>>) -> (i32, i32) {
    %c0_i32 = arith.constant 0 : i32
    %c0_i32_0 = arith.constant 0 : i32
    %c0_i32_1 = arith.constant 0 : i32
    return %c0_i32, %c0_i32_0 : i32, i32
  }
  func.func @transform_4(%arg0: i32, %arg1: memref<8xi32, #tpu.memory_space<smem>>, %arg2: memref<8xi32, #tpu.memory_space<smem>>) -> (i32, i32) {
    %c0_i32 = arith.constant 0 : i32
    %c0_i32_0 = arith.constant 0 : i32
    %c0_i32_1 = arith.constant 0 : i32
    return %c0_i32, %c0_i32_0 : i32, i32
  }
  func.func @transform_5(%arg0: i32, %arg1: memref<8xi32, #tpu.memory_space<smem>>, %arg2: memref<8xi32, #tpu.memory_space<smem>>) -> (i32, i32) {
    %c0_i32 = arith.constant 0 : i32
    %c0_i32_0 = arith.constant 0 : i32
    %c0_i32_1 = arith.constant 0 : i32
    return %c0_i32, %c0_i32_0 : i32, i32
  }
  func.func @transform_6(%arg0: i32, %arg1: memref<8xi32, #tpu.memory_space<smem>>, %arg2: memref<8xi32, #tpu.memory_space<smem>>) -> (i32, i32) {
    %c0_i32 = arith.constant 0 : i32
    %c0_i32_0 = arith.constant 0 : i32
    %c0_i32_1 = arith.constant 0 : i32
    return %c0_i32, %c0_i32_0 : i32, i32
  }
  func.func @transform_7(%arg0: i32, %arg1: memref<8xi32, #tpu.memory_space<smem>>, %arg2: memref<8xi32, #tpu.memory_space<smem>>) -> (i32, i32) {
    %c0_i32 = arith.constant 0 : i32
    %c0_i32_0 = arith.constant 0 : i32
    %c0_i32_1 = arith.constant 0 : i32
    return %c0_i32, %c0_i32_0 : i32, i32
  }
  func.func @transform_8(%arg0: i32, %arg1: memref<8xi32, #tpu.memory_space<smem>>, %arg2: memref<8xi32, #tpu.memory_space<smem>>) -> (i32, i32) {
    %c0_i32 = arith.constant 0 : i32
    %c0_i32_0 = arith.constant 0 : i32
    %c0_i32_1 = arith.constant 0 : i32
    return %c0_i32, %c0_i32_0 : i32, i32
  }
  func.func @transform_9(%arg0: i32, %arg1: memref<8xi32, #tpu.memory_space<smem>>, %arg2: memref<8xi32, #tpu.memory_space<smem>>) -> (i32, i32) {
    %c0_i32 = arith.constant 0 : i32
    %c0_i32_0 = arith.constant 0 : i32
    %c0_i32_1 = arith.constant 0 : i32
    return %c0_i32, %c0_i32_0 : i32, i32
  }
}

</mosaic_0001>

<bundles_post_ra>
// kernel: latent_model_forward.1
= control target key start
LH: loop header
LB: loop body
LE: loop exit
PB: predicated region body
PF: predicated region fallthrough
CT: control target
= control target key end

     0   :  { %s5971_s0 = inlined_call_operand.vmem [shape: s32[8], index: 0, kind: input, shape index: {}]   ;;  %s5972_s2 = inlined_call_operand.hbm [shape: f32[8,2048], index: 2, kind: input, shape index: {}]   ;;  %s5973_s3 = inlined_call_operand.vmem [shape: f32[4,128], index: 3, kind: input, shape index: {}]   ;;  %s5974_s4 = inlined_call_operand.hbm [shape: bf16[2048,256], index: 4, kind: input, shape index: {}]   ;;  %s5975_s5 = inlined_call_operand.hbm [shape: bf16[128,256], index: 5, kind: input, shape index: {}]   ;;  %s5976_s6 = inlined_call_operand.vmem [shape: f32[1,256], index: 6, kind: input, shape index: {}]   ;;  %s5977_s7 = inlined_call_operand.hbm [shape: bf16[256,768], index: 7, kind: input, shape index: {}]   ;;  %s5978_s8 = inlined_call_operand.vmem [shape: f32[1,768], index: 8, kind: input, shape index: {}]   ;;  %s5979_s9 = inlined_call_operand.vmem [shape: f32[8,768], index: 9, kind: output, shape index: {0}]   ;;  %s5980_s10 = inlined_call_operand.vmem [shape: f32[8,2048], index: 10, kind: output, shape index: {1}]   ;;  %s5981_s11 = inlined_call_operand.vmem [shape: f32[8,128], index: 11, kind: output, shape index: {2}]   ;;  %s5982_s1 = inlined_call_operand.vmem [shape: s32[8], index: 1, kind: input, shape index: {}]  }
   0x1   :  { %s17_s19 = sshll.u32 %s5971_s0, 4  ;;  %s21_s22 = sshll.u32 %s5982_s1, 4  ;;  %s18_s19 = int_to_ptr.vmem [resolvable:$true] %s17_s19  ;;  %s22_s22 = int_to_ptr.vmem [resolvable:$true] %s21_s22 }
   0x2   :  { %s4978_s23 = scalar_lea.vmem %s18_s19, 16  ;;  %p4983_p1 = scmp.lt.s32.totalorder %s18_s19, %s18_s19 }
   0x3   :  { %p4979_p0 = scmp.ne.s32.totalorder %s18_s19, %s4978_s23  ;;  %p4984_p2 = scmp.lt.s32.totalorder %s4978_s23, %s4978_s23 }
   0x5   :  { %p4985_p3 = por %p4984_p2, %p4983_p1 }
   0x7   :  { %p4986_p4 = pnand %p4985_p3, %p4979_p0 }
   0x9   :  { %4989 = shalt.err (!%p4986_p4)  }
   0xa   :  { %s5098_s24 = smov [#allocation3]   ;;  %s4990_s25 = scalar_lea.vmem %s22_s22, 16 }
   0xb   :  { %20 = dma.vmem_to_smem %s18_s19, 16, %s5098_s24, [#allocation2] }
   0xc   :  { %p4991_p5 = scmp.ne.s32.totalorder %s22_s22, %s4990_s25  ;;  %p4995_p6 = scmp.lt.s32.totalorder %s22_s22, %s22_s22 }
   0xd   :  { %p4996_p7 = scmp.lt.s32.totalorder %s4990_s25, %s4990_s25 }
   0xf   :  { %p4997_p8 = por %p4996_p7, %p4995_p6 }
  0x11   :  { %p4998_p9 = pnand %p4997_p8, %p4991_p5 }
  0x13   :  { %5001 = shalt.err (!%p4998_p9)  }
  0x14   :  { %s5099_s0 = smov [#allocation4]  }
  0x15   :  { %24 = dma.vmem_to_smem %s22_s22, 16, %s5099_s0, [#allocation2] }
  0x16   :  { %5090 = dma.done.wait [#allocation2], 32 }
  0x17   :  { %5091 = vsyncadd [#allocation2], 4294967264 }
  0x18   :  { %26 = sfence }
  0x19   :  { %27 = vsyncpa [#allocation6], 0 }
  0x1a   :  { %28 = vsyncpa [#allocation8], 0 }
  0x1b   :  { %29 = vsyncpa [#allocation11], 0  ;;  %s5100_s1 = smov [#allocation7]   ;;  %s5002_s29 = scalar_lea.hbm %s5974_s4, 32768 }
  0x1c   :  { %s47_s26 = sshll.u32 %s5100_s1, 4  ;;  %p5003_p10 = scmp.ne.s32.totalorder %s5974_s4, %s5002_s29  ;;  %s48_s26 = int_to_ptr.vmem [resolvable:$true] %s47_s26 }
  0x1d   :  { %p5006_p11 = scmp.lt.u32.totalorder %s5002_s29, %s5974_s4 }
  0x1f   :  { %p5008_p12 = pnand %p5006_p11, %p5003_p10 }
  0x21   :  { %5011 = shalt.err (!%p5008_p12)
}
  0x22   :  { %s5012_s15 = scalar_lea.vmem %s48_s26, 32768  ;;  %p5017_p0 = scmp.lt.s32.totalorder %s48_s26, %s48_s26 }
  0x23   :  { %p5013_p13 = scmp.ne.s32.totalorder %s48_s26, %s5012_s15  ;;  %p5018_p1 = scmp.lt.s32.totalorder %s5012_s15, %s5012_s15 }
  0x25   :  { %p5019_p2 = por %p5018_p1, %p5017_p0 }
  0x27   :  { %p5020_p3 = pnand %p5019_p2, %p5013_p13 }
  0x29   :  { %5023 = shalt.err (!%p5020_p3)
}
  0x2a   :  { %s5101_s16 = smov 128   ;;  %s5102_s17 = smov 8  }
  0x2b   :  { %53 = dma.hbm_to_vmem [thread:$0]  %s5974_s4, 32768, %s48_s26, [#allocation8], %s5101_s16, %s5101_s16, %s5102_s17  }
  0x2c   :  { %s5103_s20 = smov [#allocation5]   ;;  %s5104_s22 = smov [#allocation9]  }
  0x2d   :  { %s36_s21 = sshll.u32 %s5103_s20, 4  ;;  %s59_s23 = sshll.u32 %s5104_s22, 4  ;;  %s37_s21 = int_to_ptr.vmem [resolvable:$true] %s36_s21  ;;  %s60_s23 = int_to_ptr.vmem [resolvable:$true] %s59_s23 }
  0x2e   :  { %s5024_s0 = scalar_lea.hbm %s5972_s2, 2048 }
  0x2f   :  { %p5025_p4 = scmp.ne.s32.totalorder %s5972_s2, %s5024_s0  ;;  %p5028_p5 = scmp.lt.u32.totalorder %s5024_s0, %s5972_s2 }
  0x31   :  { %p5030_p6 = pnand %p5028_p5, %p5025_p4 }
  0x33   :  { %5033 = shalt.err (!%p5030_p6)
}
  0x34   :  { %s5034_s4 = scalar_lea.vmem %s37_s21, 2048  ;;  %p5039_p8 = scmp.lt.s32.totalorder %s37_s21, %s37_s21 }
  0x35   :  { %p5035_p7 = scmp.ne.s32.totalorder %s37_s21, %s5034_s4  ;;  %p5040_p9 = scmp.lt.s32.totalorder %s5034_s4, %s5034_s4 }
  0x37   :  { %p5041_p10 = por %p5040_p9, %p5039_p8 }
  0x39   :  { %p5042_p11 = pnand %p5041_p10, %p5035_p7 }
  0x3b   :  { %5045 = shalt.err (!%p5042_p11)
}
  0x3c   :  { %39 = dma.hbm_to_vmem [thread:$0]  %s5972_s2, 2048, %s37_s21, [#allocation6]  }
  0x3d   :  { %s5046_s14 = scalar_lea.hbm %s5975_s5, 2048 }
  0x3e   :  { %p5047_p12 = scmp.ne.s32.totalorder %s5975_s5, %s5046_s14  ;;  %p5050_p13 = scmp.lt.u32.totalorder %s5046_s14, %s5975_s5 }
  0x40   :  { %p5052_p0 = pnand %p5050_p13, %p5047_p12 }
  0x42   :  { %5055 = shalt.err (!%p5052_p0)
}
  0x43   :  { %s5056_s22 = scalar_lea.vmem %s60_s23, 2048  ;;  %p5061_p2 = scmp.lt.s32.totalorder %s60_s23, %s60_s23 }
  0x44   :  { %p5057_p1 = scmp.ne.s32.totalorder %s60_s23, %s5056_s22  ;;  %p5062_p3 = scmp.lt.s32.totalorder %s5056_s22, %s5056_s22 }
  0x46   :  { %p5063_p4 = por %p5062_p3, %p5061_p2 }
  0x48   :  { %p5064_p5 = pnand %p5063_p4, %p5057_p1 }
  0x4a   :  { %5067 = shalt.err (!%p5064_p5)
}
  0x4b   :  { %65 = dma.hbm_to_vmem [thread:$0]  %s5975_s5, 2048, %s60_s23, [#allocation8], %s5101_s16, %s5101_s16, %s5102_s17  }
  0x4c   :  { %s5105_s24 = smov [#allocation10]   ;;  %s5068_s27 = scalar_lea.hbm %s5977_s7, 12288 }
  0x4d   :  { %s73_s25 = sshll.u32 %s5105_s24, 4  ;;  %p5069_p6 = scmp.ne.s32.totalorder %s5977_s7, %s5068_s27  ;;  %s74_s25 = int_to_ptr.vmem [resolvable:$true] %s73_s25 }
  0x4e   :  { %p5072_p7 = scmp.lt.u32.totalorder %s5068_s27, %s5977_s7 }
  0x50   :  { %p5074_p8 = pnand %p5072_p7, %p5069_p6 }
  0x52   :  { %5077 = shalt.err (!%p5074_p8)
}
  0x53   :  { %s5078_s30 = scalar_lea.vmem %s74_s25, 12288  ;;  %p5083_p10 = scmp.lt.s32.totalorder %s74_s25, %s74_s25 }
  0x54   :  { %p5079_p9 = scmp.ne.s32.totalorder %s74_s25, %s5078_s30  ;;  %p5084_p11 = scmp.lt.s32.totalorder %s5078_s30, %s5078_s30 }
  0x56   :  { %p5085_p12 = por %p5084_p11, %p5083_p10 }
  0x58   :  { %p5086_p13 = pnand %p5085_p12, %p5079_p9 }
  0x5a   :  { %5089 = shalt.err (!%p5086_p13)
}
  0x5b   :  { %s5106_s5 = smov 384   ;;  %s5107_s16 = smov 24  }
  0x5c   :  { %79 = dma.hbm_to_vmem [thread:$0]  %s5977_s7, 12288, %s74_s25, [#allocation11], %s5106_s5, %s5106_s5, %s5107_s16  }
  0x5d   :  { %5092 = dma.done.wait [#allocation6], 2048  }
  0x5e   :  { %5093 = vsyncadd [#allocation6], 4294965248 }
  0x5f   :  { %5094 = dma.done.wait [#allocation8], 34816  }
  0x60   :  { %5095 = vsyncadd [#allocation8], 4294932480 }
  0x61   :  { %5096 = dma.done.wait [#allocation11], 12288  }
  0x62   :  { %5097 = vsyncadd [#allocation11], 4294955008  ;;  %v5108_v0 = vmov 0   ;;  %v4414_v1 = vld [vmem:[#allocation9 + $0x4] ss:$8 sps:$4 sm:$0xff]   ;;  %s5229_s12 = sld [smem:[#allocation4]]  ;;  %v273_v62 = vlaneseq }
  0x63   :  { %1492 = vmatprep.mubr.bf16.mxu0 %v5108_v0  ;;  %v4416_v2 = vld [vmem:[#allocation7 + $0x4] ss:$8 sps:$4 sm:$0xff]   ;;  %1460 = vmatprep.subr.bf16.mxu0 %v4414_v1  ;;  %v4418_v3 = vld [vmem:[#allocation9] ss:$8 sps:$4 sm:$0xff]   ;;  %v4420_v5 = vld [vmem:[#allocation9 + $0x14] ss:$8 sps:$4 sm:$0xff]  }
  0x64   :  { %v4419_v4 = vld [vmem:[#allocation7] ss:$8 sps:$4 sm:$0xff]   ;;  %2781 = vmatprep.subr.bf16.mxu1 %v4416_v2  ;;  %1461 = vmatpush1.bf16.msra.mxu0 %v4418_v3  ;;  %v4422_v6 = vld [vmem:[#allocation7 + $0x14] ss:$8 sps:$4 sm:$0xff]   ;;  %v4424_v7 = vld [vmem:[#allocation9 + $0x10] ss:$8 sps:$4 sm:$0xff]  }
  0x65   :  { %2782 = vmatpush1.bf16.msra.mxu1 %v4419_v4  ;;  %1462 = vmatprep.subr.bf16.mxu0 %v4420_v5  ;;  %v4425_v8 = vld [vmem:[#allocation7 + $0x10] ss:$8 sps:$4 sm:$0xff]   ;;  %s5231_s7 = sld [smem:[#allocation4 + $0x1]]  ;;  %v4426_v9 = vld [vmem:[#allocation9 + $0x24] ss:$8 sps:$4 sm:$0xff]   ;;  %s5233_s13 = sld [smem:[#allocation4 + $0x2]] }
  0x66   :  { %2783 = vmatprep.subr.bf16.mxu1 %v4422_v6  ;;  %v4428_v10 = vld [vmem:[#allocation7 + $0x24] ss:$8 sps:$4 sm:$0xff]   ;;  %v4430_v11 = vld [vmem:[#allocation9 + $0x20] ss:$8 sps:$4 sm:$0xff]   ;;  %v4432_v13 = vld [vmem:[#allocation9 + $0x34] ss:$8 sps:$4 sm:$0xff]  }
  0x67   :  { %v4431_v12 = vld [vmem:[#allocation7 + $0x20] ss:$8 sps:$4 sm:$0xff]   ;;  %s5235_s14 = sld [smem:[#allocation4 + $0x3]]  ;;  %v4434_v14 = vld [vmem:[#allocation7 + $0x34] ss:$8 sps:$4 sm:$0xff]   ;;  %s5237_s15 = sld [smem:[#allocation4 + $0x4]] }
  0x68   :  { %1463 = vmatpush1.bf16.msra.mxu0 %v4424_v7  ;;  %s5239_s18 = sld [smem:[#allocation4 + $0x5]]  ;;  %s5241_s19 = sld [smem:[#allocation4 + $0x6]]  ;;  %v4436_v15 = vld [vmem:[#allocation9 + $0x30] ss:$8 sps:$4 sm:$0xff]   ;;  %v4438_v17 = vld [vmem:[#allocation9 + $0x44] ss:$8 sps:$4 sm:$0xff]  }
  0x69   :  { %2784 = vmatpush1.bf16.msra.mxu1 %v4425_v8  ;;  %1464 = vmatprep.subr.bf16.mxu0 %v4426_v9  ;;  %s5243_s20 = sld [smem:[#allocation3]]  ;;  %v4437_v16 = vld [vmem:[#allocation7 + $0x30] ss:$8 sps:$4 sm:$0xff]   ;;  %v4440_v18 = vld [vmem:[#allocation7 + $0x44] ss:$8 sps:$4 sm:$0xff]   ;;  %s5245_s22 = sld [smem:[#allocation4 + $0x7]] }
  0x6a   :  { %2785 = vmatprep.subr.bf16.mxu1 %v4428_v10  ;;  %s5247_s2 = sld [smem:[#allocation3 + $0x1]]  ;;  %v4442_v19 = vld [vmem:[#allocation9 + $0x40] ss:$8 sps:$4 sm:$0xff]   ;;  %s5249_s21 = sld [smem:[#allocation3 + $0x2]]  ;;  %v4444_v21 = vld [vmem:[#allocation9 + $0x54] ss:$8 sps:$4 sm:$0xff]  }
  0x6b   :  { %v4443_v20 = vld [vmem:[#allocation7 + $0x40] ss:$8 sps:$4 sm:$0xff]   ;;  %s5251_s24 = sld [smem:[#allocation3 + $0x3]]  ;;  %v4446_v22 = vld [vmem:[#allocation7 + $0x54] ss:$8 sps:$4 sm:$0xff]   ;;  %s248_s1 = scalar_lea.vmem %s5973_s3, %s5229_s12  ;;  %vm927_vm0 = vcmask 1040384  }
  0x6c   :  { %1465 = vmatpush1.bf16.msra.mxu0 %v4430_v11  ;;  %s251_s29 = scalar_lea.vmem %s5973_s3, %s5231_s7  ;;  %s254_s30 = scalar_lea.vmem %s5973_s3, %s5233_s13  ;;  %vm944_vm1 = vcmask 1041408   ;;  %vm961_vm2 = vcmask 1042432   ;;  %v4448_v23 = vld [vmem:[#allocation9 + $0x50] ss:$8 sps:$4 sm:$0xff]   ;;  %vm978_vm3 = vcmask 1043456   ;;  %vm995_vm4 = vcmask 1044480  }
  0x6d   :  { %2786 = vmatpush1.bf16.msra.mxu1 %v4431_v12  ;;  %1466 = vmatprep.subr.bf16.mxu0 %v4432_v13  ;;  %s257_s17 = scalar_lea.vmem %s5973_s3, %s5235_s14  ;;  %s260_s0 = scalar_lea.vmem %s5973_s3, %s5237_s15  ;;  %v4449_v24 = vld [vmem:[#allocation7 + $0x50] ss:$8 sps:$4 sm:$0xff]   ;;  %v4450_v25 = vld [vmem:[#allocation9 + $0x64] ss:$8 sps:$4 sm:$0xff]   ;;  %vm1012_vm5 = vcmask 1045504   ;;  %vm1029_vm6 = vcmask 1046528  }
  0x6e   :  { %2787 = vmatprep.subr.bf16.mxu1 %v4434_v14  ;;  %s263_s7 = scalar_lea.vmem %s5973_s3, %s5239_s18  ;;  %s266_s4 = scalar_lea.vmem %s5973_s3, %s5241_s19  ;;  %v4452_v26 = vld [vmem:[#allocation7 + $0x64] ss:$8 sps:$4 sm:$0xff]   ;;  %v252_v27 = vld [vmem:[%s251_s29] sm:$0x1]  ;;  %v4456_v33 = vld [vmem:[#allocation9 + $0x74] ss:$8 sps:$4 sm:$0xff]  }
  0x6f   :  { %s96_s26 = sshra.s32 %s5243_s20, 3  ;;  %s5282_s15 = sld [smem:[#allocation3 + $0x4]]  ;;  %v4454_v28 = vld [vmem:[#allocation9 + $0x60] ss:$8 sps:$4 sm:$0xff]   ;;  %v1047_v37 = vrot.slane %v252_v27, 7  ;;  %v5332_v3 = vshrl.u32 %v273_v62, 7 }
  0x70   :  { %1467 = vmatpush1.bf16.msra.mxu0 %v4436_v15  ;;  %v4455_v29 = vld [vmem:[#allocation7 + $0x60] ss:$8 sps:$4 sm:$0xff]   ;;  %s269_s16 = scalar_lea.vmem %s5973_s3, %s5245_s22  ;;  %s99_s29 = sand.u32 7, %s5243_s20  ;;  %v4458_v40 = vld [vmem:[#allocation7 + $0x74] ss:$8 sps:$4 sm:$0xff]  }
  0x71   :  { %2788 = vmatpush1.bf16.msra.mxu1 %v4437_v16  ;;  %1468 = vmatprep.subr.bf16.mxu0 %v4438_v17  ;;  %v255_v30 = vld [vmem:[%s254_s30] sm:$0x1]  ;;  %s115_s3 = sshra.s32 %s5247_s2, 3  ;;  %s5296_s12 = sld [smem:[#allocation3 + $0x5]]  ;;  %v4460_v45 = vld [vmem:[#allocation9 + $0x70] ss:$8 sps:$4 sm:$0xff]  }
  0x72   :  { %2789 = vmatprep.subr.bf16.mxu1 %v4440_v18  ;;  %v258_v31 = vld [vmem:[%s257_s17] sm:$0x1]  ;;  %v1050_v38 = vrot.slane %v255_v30, 6  ;;  %s4387_s22 = sshll.u32 %s96_s26, 7  ;;  %v4461_v48 = vld [vmem:[#allocation7 + $0x70] ss:$8 sps:$4 sm:$0xff]  }
  0x73   :  { %v261_v32 = vld [vmem:[%s260_s0] sm:$0x1]  ;;  %v1053_v39 = vrot.slane %v258_v31, 5  ;;  %v4462_v52 = vld [vmem:[#allocation7 + $0x84] ss:$8 sps:$4 sm:$0xff]   ;;  %s118_s30 = sand.u32 7, %s5247_s2  ;;  %s5313_s2 = sadd.s32 %s4387_s22, %s99_s29 }
  0x74   :  { %1469 = vmatpush1.bf16.msra.mxu0 %v4442_v19  ;;  %v249_v34 = vld [vmem:[%s248_s1] sm:$0x1]  ;;  %v1056_v42 = vrot.slane %v261_v32, 4  ;;  %s134_s1 = sshra.s32 %s5249_s21, 3  ;;  %v4466_v53 = vld [vmem:[#allocation7 + $0x104] ss:$8 sps:$4 sm:$0xff]  }
  0x75   :  { %2790 = vmatpush1.bf16.msra.mxu1 %v4443_v20  ;;  %1470 = vmatprep.subr.bf16.mxu0 %v4444_v21  ;;  %v264_v35 = vld [vmem:[%s263_s7] sm:$0x1]  ;;  %v1067_v44 = vsel %vm927_vm0, %v249_v34, %v1047_v37  ;;  %s4389_s17 = sshll.u32 %s115_s3, 7  ;;  %s137_s25 = sand.u32 7, %s5249_s21  ;;  %v4468_v59 = vld [vmem:[#allocation7 + $0x94] ss:$8 sps:$4 sm:$0xff]  }
  0x76   :  { %2791 = vmatprep.subr.bf16.mxu1 %v4446_v22  ;;  %v267_v36 = vld [vmem:[%s266_s4] sm:$0x1]  ;;  %v1059_v43 = vrot.slane %v264_v35, 3  ;;  %v1068_v47 = vsel %vm944_vm1, %v1067_v44, %v1050_v38  ;;  %s153_s0 = sshra.s32 %s5251_s24, 3  ;;  %s4391_s27 = sshll.u32 %s134_s1, 7  ;;  %v5343_v8 = vsub.s32 1, %v5332_v3 }
  0x77   :  { %v270_v41 = vld [vmem:[%s269_s16] sm:$0x1]  ;;  %v1062_v46 = vrot.slane %v267_v36, 2  ;;  %v1069_v50 = vsel %vm961_vm2, %v1068_v47, %v1053_v39  ;;  %s172_s28 = sshra.s32 %s5282_s15, 3  ;;  %s156_s7 = sand.u32 7, %s5251_s24  ;;  %v5346_v9 = vsub.s32 0, %v5332_v3 }
  0x78   :  { %1471 = vmatpush1.bf16.msra.mxu0 %v4448_v23  ;;  %v1065_v49 = vrot.slane %v270_v41, 1  ;;  %v1070_v51 = vsel %vm978_vm3, %v1069_v50, %v1056_v42  ;;  %v4464_v56 = vld [vmem:[#allocation7 + $0x100] ss:$8 sps:$4 sm:$0xff]   ;;  %v4472_v61 = vld [vmem:[#allocation7 + $0x114] ss:$8 sps:$4 sm:$0xff]   ;;  %s4393_s4 = sshll.u32 %s153_s0, 7  ;;  %s5321_s20 = sadd.s32 %s4389_s17, %s118_s30 }
  0x79   :  { %2792 = vmatpush1.bf16.msra.mxu1 %v4449_v24  ;;  %1472 = vmatprep.subr.bf16.mxu0 %v4450_v25  ;;  %v1071_v54 = vsel %vm995_vm4, %v1070_v51, %v1059_v43  ;;  %v4467_v58 = vld [vmem:[#allocation7 + $0x80] ss:$8 sps:$4 sm:$0xff]   ;;  %s175_s26 = sand.u32 7, %s5282_s15  ;;  %s4395_s18 = sshll.u32 %s172_s28, 7  ;;  %v4470_v63 = vld [vmem:[#allocation7 + $0x110] ss:$8 sps:$4 sm:$0xff]  }
  0x7a   :  { %2793 = vmatprep.subr.bf16.mxu1 %v4452_v26  ;;  %v1072_v55 = vsel %vm1012_vm5, %v1071_v54, %v1062_v46  ;;  %s191_s5 = sshra.s32 %s5296_s12, 3  ;;  %s5323_s24 = sld [smem:[#allocation3 + $0x6]]  ;;  %v4473_v0 = vld [vmem:[#allocation7 + $0x90] ss:$8 sps:$4 sm:$0xff]   ;;  %v4474_v1 = vld [vmem:[#allocation7 + $0xa4] ss:$8 sps:$4 sm:$0xff]  }
  0x7b   :  { %v1073_v57 = vsel %vm1029_vm6, %v1072_v55, %v1065_v49  ;;  %s5329_s16 = sld [smem:[#allocation3 + $0x7]]  ;;  %v4478_v2 = vld [vmem:[#allocation7 + $0x124] ss:$8 sps:$4 sm:$0xff]   ;;  %s194_s15 = sand.u32 7, %s5296_s12  ;;  %v4476_v4 = vld [vmem:[#allocation7 + $0x120] ss:$8 sps:$4 sm:$0xff]  }
  0x7c   :  { %1473 = vmatpush1.bf16.msra.mxu0 %v4454_v28  ;;  %1090 = vst [vmem:[%s5981_s11] sm:$0xff] %v1073_v57  ;;  %v1363_v60 = vpack.c.bf16 %v1073_v57, %v1073_v57  ;;  %s5327_s11 = sadd.s32 %s4391_s27, %s137_s25  ;;  %s4397_s19 = sshll.u32 %s191_s5, 7  ;;  %v4479_v5 = vld [vmem:[#allocation7 + $0xa0] ss:$8 sps:$4 sm:$0xff]   ;;  %v4480_v6 = vld [vmem:[#allocation7 + $0xb4] ss:$8 sps:$4 sm:$0xff]   ;;  %v5351_v11 = vsub.s32 3, %v5332_v3 }
  0x7d   :  { %2794 = vmatpush1.bf16.msra.mxu1 %v4455_v29  ;;  %1474 = vmatprep.subr.bf16.mxu0 %v4456_v33  ;;  %s5334_s23 = sadd.s32 %s4393_s4, %s156_s7  ;;  %s5336_s21 = sadd.s32 %s4395_s18, %s175_s26  ;;  %v4484_v7 = vld [vmem:[#allocation7 + $0x134] ss:$8 sps:$4 sm:$0xff]   ;;  %v4482_v10 = vld [vmem:[#allocation7 + $0x130] ss:$8 sps:$4 sm:$0xff]   ;;  %v4486_v13 = vld [vmem:[#allocation7 + $0xc4] ss:$8 sps:$4 sm:$0xff]  }
  0x7e   :  { %2795 = vmatprep.subr.bf16.mxu1 %v4458_v40  ;;  %s5338_s29 = sadd.s32 %s4397_s19, %s194_s15  ;;  %v4485_v12 = vld [vmem:[#allocation7 + $0xb0] ss:$8 sps:$4 sm:$0xff]   ;;  %v4490_v14 = vld [vmem:[#allocation7 + $0x144] ss:$8 sps:$4 sm:$0xff]   ;;  %v4488_v15 = vld [vmem:[#allocation7 + $0x140] ss:$8 sps:$4 sm:$0xff]  }
  0x7f   :  { %v4491_v16 = vld [vmem:[#allocation7 + $0xc0] ss:$8 sps:$4 sm:$0xff]   ;;  %s5356_s25 = scalar_lea.vmem [#allocation5], %s5313_s2  ;;  %v4492_v19 = vld [vmem:[#allocation7 + $0xd4] ss:$8 sps:$4 sm:$0xff]   ;;  %s5363_s0 = scalar_lea.vmem [#allocation5], %s5321_s20 }
  0x80   :  { %1475 = vmatpush1.bf16.msra.mxu0 %v4460_v45  ;;  %s210_s3 = sshra.s32 %s5323_s24, 3  ;;  %s213_s12 = sand.u32 7, %s5323_s24  ;;  %v104_v17 = vld [vmem:[%s5356_s25] ss:$8 sm:$0xf] }
  0x81   :  { %2796 = vmatpush1.bf16.msra.mxu1 %v4461_v48  ;;  %2822 = vmatprep.subr.bf16.mxu0 %v4466_v53  ;;  %s4399_s22 = sshll.u32 %s210_s3, 7  ;;  %s229_s30 = sshra.s32 %s5329_s16, 3  ;;  %v105_v18 = vld [vmem:[%s5356_s25] ss:$8 sm:$0xf0] }
  0x82   :  { %2797 = vmatprep.subr.bf16.mxu1 %v4462_v52  ;;  %s5348_s1 = sadd.s32 %s4399_s22, %s213_s12  ;;  %s232_s17 = sand.u32 7, %s5329_s16  ;;  %v4496_v20 = vld [vmem:[#allocation7 + $0x154] ss:$8 sps:$4 sm:$0xff]   ;;  %v5360_v21 = vor.u32 %v105_v18, %v104_v17  ;;  %v123_v22 = vld [vmem:[%s5363_s0] ss:$8 sm:$0xf] }
  0x83   :  { %1493 = vmatmul.mubr.bf16.vlgmr.msra.gmra.mrb[0].mxu0 %v1363_v60  ;;  %v124_v23 = vld [vmem:[%s5363_s0] ss:$8 sm:$0xf0]  ;;  %s5370_s27 = scalar_lea.vmem [#allocation5], %s5327_s11  ;;  %s5377_s28 = scalar_lea.vmem [#allocation5], %s5334_s23 }
  0x84   :  { %2823 = vmatpush1.bf16.msra.mxu0 %v4464_v56  ;;  %v5367_v24 = vor.u32 %v124_v23, %v123_v22  ;;  %v142_v25 = vld [vmem:[%s5370_s27] ss:$8 sm:$0xf]  ;;  %v280_v30 = vrot.slane %v5360_v21, %v5343_v8  ;;  %v276_v31 = vrot.slane %v5360_v21, %v5346_v9  ;;  %s5388_s2 = scalar_lea.vmem [#allocation5], %s5336_s21  ;;  %v288_v39 = vrot.slane %v5360_v21, %v5351_v11  ;;  %v4498_v40 = vld [vmem:[#allocation7 + $0xe4] ss:$8 sps:$4 sm:$0xff]  }
  0x85   :  { %2798 = vmatpush1.bf16.msra.mxu1 %v4467_v58  ;;  %2824 = vmatprep.subr.bf16.mxu0 %v4472_v61  ;;  %v143_v26 = vld [vmem:[%s5370_s27] ss:$8 sm:$0xf0]  ;;  %s5401_s7 = scalar_lea.vmem [#allocation5], %s5338_s29  ;;  %s5414_s13 = scalar_lea.vmem [#allocation5], %s5348_s1 }
  0x86   :  { %2799 = vmatprep.subr.bf16.mxu1 %v4468_v59  ;;  %v5374_v27 = vor.u32 %v143_v26, %v142_v25  ;;  %v161_v28 = vld [vmem:[%s5377_s28] ss:$8 sm:$0xf]  ;;  %v362_v37 = vrot.slane %v5367_v24, %v5343_v8  ;;  %v358_v38 = vrot.slane %v5367_v24, %v5346_v9  ;;  %v370_v46 = vrot.slane %v5367_v24, %v5351_v11  ;;  %v4502_v52 = vld [vmem:[#allocation7 + $0x164] ss:$8 sps:$4 sm:$0xff]   ;;  %s4401_s14 = sshll.u32 %s229_s30, 7 }
  0x87   :  { %v162_v29 = vld [vmem:[%s5377_s28] ss:$8 sm:$0xf0]  ;;  %s235_s4 = sadd.s32 %s4401_s14, %s232_s17 }
  0x88   :  { %2825 = vmatpush1.bf16.msra.mxu0 %v4470_v63  ;;  %v4494_v32 = vld [vmem:[#allocation7 + $0x150] ss:$8 sps:$4 sm:$0xff]   ;;  %v5385_v34 = vor.u32 %v162_v29, %v161_v28  ;;  %v444_v44 = vrot.slane %v5374_v27, %v5343_v8  ;;  %v440_v45 = vrot.slane %v5374_v27, %v5346_v9  ;;  %v929_v51 = vsel %vm927_vm0, %v280_v30, %v362_v37  ;;  %v4500_v60 = vld [vmem:[#allocation7 + $0x160] ss:$8 sps:$4 sm:$0xff]   ;;  %s5444_s26 = scalar_lea.vmem [#allocation5], %s235_s4 }
  0x89   :  { %2800 = vmatpush1.bf16.msra.mxu1 %v4473_v0  ;;  %2826 = vmatprep.subr.bf16.mxu0 %v4478_v2  ;;  %v4497_v33 = vld [vmem:[#allocation7 + $0xd0] ss:$8 sps:$4 sm:$0xff]   ;;  %v4503_v61 = vld [vmem:[#allocation7 + $0xe0] ss:$8 sps:$4 sm:$0xff]  }
  0x8a   :  { %2801 = vmatprep.subr.bf16.mxu1 %v4474_v1  ;;  %v180_v35 = vld [vmem:[%s5388_s2] ss:$8 sm:$0xf]  ;;  %v526_v50 = vrot.slane %v5385_v34, %v5343_v8  ;;  %v946_v55 = vsel %vm944_vm1, %v929_v51, %v444_v44  ;;  %v522_v58 = vrot.slane %v5385_v34, %v5346_v9  ;;  %v534_v18 = vrot.slane %v5385_v34, %v5351_v11 }
  0x8b   :  { %v181_v36 = vld [vmem:[%s5388_s2] ss:$8 sm:$0xf0] }
  0x8c   :  { %2827 = vmatpush1.bf16.msra.mxu0 %v4476_v4  ;;  %v5398_v41 = vor.u32 %v181_v36, %v180_v35  ;;  %v199_v42 = vld [vmem:[%s5401_s7] ss:$8 sm:$0xf]  ;;  %v963_v57 = vsel %vm961_vm2, %v946_v55, %v526_v50  ;;  %v4512_v36 = vld [vmem:[#allocation7 + $0x184] ss:$8 sps:$4 sm:$0xff]  }
  0x8d   :  { %2802 = vmatpush1.bf16.msra.mxu1 %v4479_v5  ;;  %2828 = vmatprep.subr.bf16.mxu0 %v4484_v7  ;;  %v200_v43 = vld [vmem:[%s5401_s7] ss:$8 sm:$0xf0]  ;;  %v452_v7 = vrot.slane %v5374_v27, %v5351_v11  ;;  %v4518_v55 = vld [vmem:[#allocation7 + $0x194] ss:$8 sps:$4 sm:$0xff]  }
  0x8e   :  { %2803 = vmatprep.subr.bf16.mxu1 %v4480_v6  ;;  %v5411_v47 = vor.u32 %v200_v43, %v199_v42  ;;  %v218_v48 = vld [vmem:[%s5414_s13] ss:$8 sm:$0xf]  ;;  %v608_v54 = vrot.slane %v5398_v41, %v5343_v8  ;;  %v604_v59 = vrot.slane %v5398_v41, %v5346_v9  ;;  %v928_v6 = vsel %vm927_vm0, %v276_v31, %v358_v38 }
  0x8f   :  { %v219_v49 = vld [vmem:[%s5414_s13] ss:$8 sm:$0xf0]  ;;  %v5484_v38 = vsub.s32 5, %v5332_v3 }
  0x90   :  { %2829 = vmatpush1.bf16.msra.mxu0 %v4482_v10  ;;  %v5421_v53 = vor.u32 %v219_v49, %v218_v48  ;;  %v690_v56 = vrot.slane %v5411_v47, %v5343_v8  ;;  %v980_v63 = vsel %vm978_vm3, %v963_v57, %v608_v54  ;;  %v686_v0 = vrot.slane %v5411_v47, %v5346_v9  ;;  %v237_v2 = vld [vmem:[%s5444_s26] ss:$8 sm:$0xf]  ;;  %v4504_v10 = vld [vmem:[#allocation7 + $0xf4] ss:$8 sps:$4 sm:$0xff]  }
  0x91   :  { %2804 = vmatpush1.bf16.msra.mxu1 %v4485_v12  ;;  %2830 = vmatprep.subr.bf16.mxu0 %v4490_v14  ;;  %v238_v4 = vld [vmem:[%s5444_s26] ss:$8 sm:$0xf0]  ;;  %v4508_v12 = vld [vmem:[#allocation7 + $0x174] ss:$8 sps:$4 sm:$0xff]  }
  0x92   :  { %2805 = vmatprep.subr.bf16.mxu1 %v4486_v13  ;;  %v772_v62 = vrot.slane %v5421_v53, %v5343_v8  ;;  %v768_v1 = vrot.slane %v5421_v53, %v5346_v9  ;;  %v997_v5 = vsel %vm995_vm4, %v980_v63, %v690_v56  ;;  %v5452_v13 = vor.u32 %v238_v4, %v237_v2  ;;  %v4506_v28 = vld [vmem:[#allocation7 + $0x170] ss:$8 sps:$4 sm:$0xff]   ;;  %v4510_v50 = vld [vmem:[#allocation7 + $0x180] ss:$8 sps:$4 sm:$0xff]   ;;  %v4521_v56 = vld [vmem:[#allocation7 + $0x214] ss:$8 sps:$4 sm:$0xff]  }
  0x93   :  { %v780_v26 = vrot.slane %v5421_v53, %v5351_v11  ;;  %v4509_v29 = vld [vmem:[#allocation7 + $0xf0] ss:$8 sps:$4 sm:$0xff]   ;;  %v4513_v51 = vld [vmem:[#allocation7 + $0x200] ss:$8 sps:$4 sm:$0xff]   ;;  %v378_v4 = vrot.slane %v5367_v24, %v5484_v38 }
  0x94   :  { %2831 = vmatpush1.bf16.msra.mxu0 %v4488_v15  ;;  %v1014_v14 = vsel %vm1012_vm5, %v997_v5, %v772_v62  ;;  %v945_v15 = vsel %vm944_vm1, %v928_v6, %v440_v45  ;;  %v854_v22 = vrot.slane %v5452_v13, %v5343_v8  ;;  %v850_v23 = vrot.slane %v5452_v13, %v5346_v9  ;;  %v4516_v6 = vld [vmem:[#allocation7 + $0x190] ss:$8 sps:$4 sm:$0xff]  }
  0x95   :  { %2806 = vmatpush1.bf16.msra.mxu1 %v4491_v16  ;;  %2832 = vmatprep.subr.bf16.mxu0 %v4496_v20  ;;  %v5457_v16 = vsub.s32 2, %v5332_v3  ;;  %v962_v17 = vsel %vm961_vm2, %v945_v15, %v522_v58  ;;  %v698_v20 = vrot.slane %v5411_v47, %v5351_v11  ;;  %v862_v31 = vrot.slane %v5452_v13, %v5351_v11  ;;  %v4524_v15 = vld [vmem:[#allocation7 + $0x1a4] ss:$8 sps:$4 sm:$0xff]  }
  0x96   :  { %2807 = vmatprep.subr.bf16.mxu1 %v4492_v19  ;;  %v616_v19 = vrot.slane %v5398_v41, %v5351_v11  ;;  %v979_v25 = vsel %vm978_vm3, %v962_v17, %v604_v59  ;;  %v460_v5 = vrot.slane %v5374_v27, %v5484_v38  ;;  %v4527_v17 = vld [vmem:[#allocation7 + $0x224] ss:$8 sps:$4 sm:$0xff]  }
  0x97   :  { %v996_v30 = vsel %vm995_vm4, %v979_v25, %v686_v0  ;;  %v284_v44 = vrot.slane %v5360_v21, %v5457_v16  ;;  %v366_v48 = vrot.slane %v5367_v24, %v5457_v16  ;;  %v448_v49 = vrot.slane %v5374_v27, %v5457_v16 }
  0x98   :  { %2833 = vmatpush1.bf16.msra.mxu0 %v4494_v32  ;;  %v931_v32 = vsel %vm927_vm0, %v288_v39, %v370_v46  ;;  %v1013_v35 = vsel %vm1012_vm5, %v996_v30, %v768_v1  ;;  %v4515_v39 = vld [vmem:[#allocation7 + $0x204] ss:$8 sps:$4 sm:$0xff]   ;;  %v530_v54 = vrot.slane %v5385_v34, %v5457_v16  ;;  %v612_v58 = vrot.slane %v5398_v41, %v5457_v16 }
  0x99   :  { %2808 = vmatpush1.bf16.msra.mxu1 %v4497_v33  ;;  %2834 = vmatprep.subr.bf16.mxu0 %v4502_v52  ;;  %v1031_v33 = vsel %vm1029_vm6, %v1014_v14, %v854_v22  ;;  %v948_v37 = vsel %vm944_vm1, %v931_v32, %v452_v7  ;;  %v1030_v42 = vsel %vm1029_vm6, %v1013_v35, %v850_v23  ;;  %v4519_v7 = vld [vmem:[#allocation7 + $0x210] ss:$8 sps:$4 sm:$0xff]   ;;  %v5537_v22 = vsub.s32 7, %v5332_v3  ;;  %v4525_v35 = vld [vmem:[#allocation7 + $0x220] ss:$8 sps:$4 sm:$0xff]  }
  0x9a   :  { %2809 = vmatprep.subr.bf16.mxu1 %v4498_v40  ;;  %1075 = vst [vmem:[%s5980_s10 + $0x8] sm:$0xff] %v1031_v33  ;;  %v1092_v40 = vpack.c.bf16 %v1031_v33, %v1031_v33  ;;  %v965_v43 = vsel %vm961_vm2, %v948_v37, %v534_v18  ;;  %1074 = vst [vmem:[%s5980_s10] sm:$0xff] %v1030_v42  ;;  %v1091_v45 = vpack.c.bf16 %v1030_v42, %v1030_v42  ;;  %v4522_v33 = vld [vmem:[#allocation7 + $0x1a0] ss:$8 sps:$4 sm:$0xff]   ;;  %v4530_v42 = vld [vmem:[#allocation7 + $0x1b4] ss:$8 sps:$4 sm:$0xff]  }
  0x9b   :  { %v982_v46 = vsel %vm978_vm3, %v965_v43, %v616_v19  ;;  %v694_v59 = vrot.slane %v5411_v47, %v5457_v16  ;;  %v776_v62 = vrot.slane %v5421_v53, %v5457_v16  ;;  %v930_v63 = vsel %vm927_vm0, %v284_v44, %v366_v48 }
  0x9c   :  { %2835 = vmatpush1.bf16.msra.mxu0 %v4500_v60  ;;  %v999_v52 = vsel %vm995_vm4, %v982_v46, %v698_v20  ;;  %2813 = vmatprep.mubr.bf16.mxu1 %v1092_v40  ;;  %v5510_v60 = vsub.s32 4, %v5332_v3  ;;  %v296_v0 = vrot.slane %v5360_v21, %v5484_v38  ;;  %v947_v2 = vsel %vm944_vm1, %v930_v63, %v448_v49  ;;  %v4539_v63 = vld [vmem:[#allocation7 + $0x244] ss:$8 sps:$4 sm:$0xff]  }
  0x9d   :  { %2810 = vmatpush1.bf16.msra.mxu1 %v4503_v61  ;;  %2836 = vmatprep.subr.bf16.mxu0 %v4508_v12  ;;  %v1016_v57 = vsel %vm1012_vm5, %v999_v52, %v780_v26  ;;  %v964_v12 = vsel %vm961_vm2, %v947_v2, %v530_v54  ;;  %v542_v14 = vrot.slane %v5385_v34, %v5484_v38  ;;  %v5567_v46 = vsub.s32 6, %v5332_v3 }
  0x9e   :  { %2811 = vmatprep.subr.bf16.mxu1 %v4504_v10  ;;  %v1033_v61 = vsel %vm1029_vm6, %v1016_v57, %v862_v31  ;;  %v858_v10 = vrot.slane %v5452_v13, %v5457_v16  ;;  %v981_v18 = vsel %vm978_vm3, %v964_v12, %v612_v58  ;;  %v624_v19 = vrot.slane %v5398_v41, %v5484_v38  ;;  %v4531_v57 = vld [vmem:[#allocation7 + $0x230] ss:$8 sps:$4 sm:$0xff]  }
  0x9f   :  { %1077 = vst [vmem:[%s5980_s10 + $0x18] sm:$0xff] %v1033_v61  ;;  %v1094_v1 = vpack.c.bf16 %v1033_v61, %v1033_v61  ;;  %v706_v20 = vrot.slane %v5411_v47, %v5484_v38  ;;  %v998_v23 = vsel %vm995_vm4, %v981_v18, %v694_v59  ;;  %v788_v25 = vrot.slane %v5421_v53, %v5484_v38  ;;  %v4537_v18 = vld [vmem:[#allocation7 + $0x240] ss:$8 sps:$4 sm:$0xff]  }
  0xa0   :  { %2837 = vmatpush1.bf16.msra.mxu0 %v4506_v28  ;;  %v870_v26 = vrot.slane %v5452_v13, %v5484_v38  ;;  %v933_v28 = vsel %vm927_vm0, %v296_v0, %v378_v4  ;;  %v292_v31 = vrot.slane %v5360_v21, %v5510_v60  ;;  %v374_v32 = vrot.slane %v5367_v24, %v5510_v60 }
  0xa1   :  { %2812 = vmatpush1.bf16.msra.mxu1 %v4509_v29  ;;  %2838 = vmatprep.subr.bf16.mxu0 %v4512_v36  ;;  %v1015_v29 = vsel %vm1012_vm5, %v998_v23, %v776_v62  ;;  %v950_v30 = vsel %vm944_vm1, %v933_v28, %v460_v5  ;;  %v456_v40 = vrot.slane %v5374_v27, %v5510_v60  ;;  %v4536_v62 = vld [vmem:[#allocation7 + $0x1c4] ss:$8 sps:$4 sm:$0xff]  }
  0xa2   :  { %2863 = vmatprep.subr.bf16.mxu1 %v4515_v39  ;;  %2854 = vmatprep.mubr.bf16.mxu0 %v1094_v1  ;;  %v5552_v36 = vsel %vm1029_vm6, %v1015_v29, %v858_v10  ;;  %v967_v37 = vsel %vm961_vm2, %v950_v30, %v542_v14  ;;  %v4533_v39 = vld [vmem:[#allocation7 + $0x234] ss:$8 sps:$4 sm:$0xff]   ;;  %v538_v44 = vrot.slane %v5385_v34, %v5510_v60 }
  0xa3   :  { %1076 = vst [vmem:[%s5980_s10 + $0x10] sm:$0xff] %v5552_v36  ;;  %v984_v43 = vsel %vm978_vm3, %v967_v37, %v624_v19  ;;  %v702_v49 = vrot.slane %v5411_v47, %v5510_v60  ;;  %v932_v54 = vsel %vm927_vm0, %v292_v31, %v374_v32  ;;  %v386_v3 = vrot.slane %v5367_v24, %v5537_v22 }
  0xa4   :  { %2814 = vmatmul.mubr.bf16.vlgmr.msra.gmra.mrb[0].mxu1 %v1091_v45  ;;  %2839 = vmatpush1.bf16.msra.mxu0 %v4510_v50  ;;  %v620_v45 = vrot.slane %v5398_v41, %v5510_v60  ;;  %v1001_v48 = vsel %vm995_vm4, %v984_v43, %v706_v20  ;;  %v784_v50 = vrot.slane %v5421_v53, %v5510_v60 }
  0xa5   :  { %2864 = vmatpush1.bf16.msra.mxu1 %v4513_v51  ;;  %2840 = vmatprep.subr.bf16.mxu0 %v4518_v55  ;;  %v866_v51 = vrot.slane %v5452_v13, %v5510_v60  ;;  %v1018_v52 = vsel %vm1012_vm5, %v1001_v48, %v788_v25  ;;  %v304_v55 = vrot.slane %v5360_v21, %v5537_v22  ;;  %v4542_v25 = vld [vmem:[#allocation7 + $0x1d4] ss:$8 sps:$4 sm:$0xff]   ;;  %v4546_v48 = vld [vmem:[#allocation7 + $0x1e0] ss:$8 sps:$4 sm:$0xff]  }
  0xa6   :  { %2865 = vmatprep.subr.bf16.mxu1 %v4521_v56  ;;  %v4528_v56 = vld [vmem:[#allocation7 + $0x1b0] ss:$8 sps:$4 sm:$0xff]   ;;  %v1035_v58 = vsel %vm1029_vm6, %v1018_v52, %v870_v26  ;;  %v949_v59 = vsel %vm944_vm1, %v932_v54, %v456_v40  ;;  %v468_v61 = vrot.slane %v5374_v27, %v5537_v22  ;;  %v550_v2 = vrot.slane %v5385_v34, %v5537_v22  ;;  %v4545_v26 = vld [vmem:[#allocation7 + $0x254] ss:$8 sps:$4 sm:$0xff]  }
  0xa7   :  { %1079 = vst [vmem:[%s5980_s10 + $0x28] sm:$0xff] %v1035_v58  ;;  %v1096_v0 = vpack.c.bf16 %v1035_v58, %v1035_v58  ;;  %v966_v1 = vsel %vm961_vm2, %v949_v59, %v538_v44  ;;  %v632_v5 = vrot.slane %v5398_v41, %v5537_v22  ;;  %v878_v12 = vrot.slane %v5452_v13, %v5537_v22  ;;  %v4558_v58 = vld [vmem:[#allocation7 + $0x280] ss:$8 sps:$4 sm:$0xff]  }
  0xa8   :  { %2841 = vmatpush1.bf16.msra.mxu0 %v4516_v6  ;;  %v983_v4 = vsel %vm978_vm3, %v966_v1, %v620_v45  ;;  %v714_v6 = vrot.slane %v5411_v47, %v5537_v22  ;;  %v935_v14 = vsel %vm927_vm0, %v304_v55, %v386_v3  ;;  %v382_v23 = vrot.slane %v5367_v24, %v5567_v46  ;;  %v4555_v55 = vld [vmem:[#allocation7 + $0x270] ss:$8 sps:$4 sm:$0xff]   ;;  %v4560_v3 = vld [vmem:[#allocation7 + $0x284] ss:$8 sps:$4 sm:$0xff]   ;;  %v4561_v59 = vld [vmem:[#allocation7 + $0x300] ss:$8 sps:$4 sm:$0xff]  }
  0xa9   :  { %2866 = vmatpush1.bf16.msra.mxu1 %v4519_v7  ;;  %2842 = vmatprep.subr.bf16.mxu0 %v4524_v15  ;;  %v796_v7 = vrot.slane %v5421_v53, %v5537_v22  ;;  %v1000_v10 = vsel %vm995_vm4, %v983_v4, %v702_v49  ;;  %v300_v15 = vrot.slane %v5360_v21, %v5567_v46  ;;  %v4549_v49 = vld [vmem:[#allocation7 + $0x260] ss:$8 sps:$4 sm:$0xff]   ;;  %v4567_v1 = vld [vmem:[#allocation7 + $0x310] ss:$8 sps:$4 sm:$0xff]   ;;  %v4575_v4 = vld [vmem:[#allocation7 + $0x324] ss:$8 sps:$4 sm:$0xff]  }
  0xaa   :  { %2867 = vmatprep.subr.bf16.mxu1 %v4527_v17  ;;  %2895 = vmatprep.mubr.bf16.mxu1 %v1096_v0  ;;  %v4534_v17 = vld [vmem:[#allocation7 + $0x1c0] ss:$8 sps:$4 sm:$0xff]   ;;  %v1017_v19 = vsel %vm1012_vm5, %v1000_v10, %v784_v50  ;;  %v952_v20 = vsel %vm944_vm1, %v935_v14, %v468_v61  ;;  %v464_v29 = vrot.slane %v5374_v27, %v5567_v46  ;;  %v4566_v61 = vld [vmem:[#allocation7 + $0x294] ss:$8 sps:$4 sm:$0xff]   ;;  %v4564_v0 = vld [vmem:[#allocation7 + $0x290] ss:$8 sps:$4 sm:$0xff]  }
  0xab   :  { %v5610_v28 = vsel %vm1029_vm6, %v1017_v19, %v866_v51  ;;  %v969_v21 = vsel %vm961_vm2, %v952_v20, %v550_v2  ;;  %v546_v24 = vrot.slane %v5385_v34, %v5567_v46  ;;  %v628_v32 = vrot.slane %v5398_v41, %v5567_v46  ;;  %v4551_v34 = vld [vmem:[#allocation7 + $0x264] ss:$8 sps:$4 sm:$0xff]   ;;  %v4557_v51 = vld [vmem:[#allocation7 + $0x274] ss:$8 sps:$4 sm:$0xff]   ;;  %v4576_v10 = vld [vmem:[#allocation7 + $0x2b0] ss:$8 sps:$4 sm:$0xff]  }
  0xac   :  { %2843 = vmatpush1.bf16.msra.mxu0 %v4522_v33  ;;  %1078 = vst [vmem:[%s5980_s10 + $0x20] sm:$0xff] %v5610_v28  ;;  %v986_v30 = vsel %vm978_vm3, %v969_v21, %v632_v5  ;;  %v4540_v33 = vld [vmem:[#allocation7 + $0x1d0] ss:$8 sps:$4 sm:$0xff]   ;;  %v710_v37 = vrot.slane %v5411_v47, %v5567_v46  ;;  %v934_v40 = vsel %vm927_vm0, %v300_v15, %v382_v23  ;;  %v4572_v2 = vld [vmem:[#allocation7 + $0x2a4] ss:$8 sps:$4 sm:$0xff]  }
  0xad   :  { %2868 = vmatpush1.bf16.msra.mxu1 %v4525_v35  ;;  %2844 = vmatprep.subr.bf16.mxu0 %v4530_v42  ;;  %v1003_v31 = vsel %vm995_vm4, %v986_v30, %v714_v6  ;;  %v4543_v35 = vld [vmem:[#allocation7 + $0x250] ss:$8 sps:$4 sm:$0xff]   ;;  %v4548_v42 = vld [vmem:[#allocation7 + $0x1e4] ss:$8 sps:$4 sm:$0xff]   ;;  %v792_v41 = vrot.slane %v5421_v53, %v5567_v46  ;;  %v951_v43 = vsel %vm944_vm1, %v934_v40, %v464_v29  ;;  %v4554_v53 = vld [vmem:[#allocation7 + $0x1f4] ss:$8 sps:$4 sm:$0xff]  }
  0xae   :  { %2869 = vmatprep.subr.bf16.mxu1 %v4533_v39  ;;  %v1020_v27 = vsel %vm1012_vm5, %v1003_v31, %v796_v7  ;;  %v874_v47 = vrot.slane %v5452_v13, %v5567_v46  ;;  %v968_v44 = vsel %vm961_vm2, %v951_v43, %v546_v24  ;;  %v4552_v13 = vld [vmem:[#allocation7 + $0x1f0] ss:$8 sps:$4 sm:$0xff]   ;;  %v4573_v5 = vld [vmem:[#allocation7 + $0x320] ss:$8 sps:$4 sm:$0xff]   ;;  %v4578_v6 = vld [vmem:[#allocation7 + $0x2b4] ss:$8 sps:$4 sm:$0xff]  }
  0xaf   :  { %v1037_v39 = vsel %vm1029_vm6, %v1020_v27, %v878_v12  ;;  %v985_v45 = vsel %vm978_vm3, %v968_v44, %v628_v32  ;;  %v4581_v7 = vld [vmem:[#allocation7 + $0x334] ss:$8 sps:$4 sm:$0xff]   ;;  %v4579_v12 = vld [vmem:[#allocation7 + $0x330] ss:$8 sps:$4 sm:$0xff]   ;;  %v4584_v14 = vld [vmem:[#allocation7 + $0x2c4] ss:$8 sps:$4 sm:$0xff]  }
  0xb0   :  { %2845 = vmatpush1.bf16.msra.mxu0 %v4528_v56  ;;  %1081 = vst [vmem:[%s5980_s10 + $0x38] sm:$0xff] %v1037_v39  ;;  %v1002_v50 = vsel %vm995_vm4, %v985_v45, %v710_v37  ;;  %v4563_v56 = vld [vmem:[#allocation7 + $0x304] ss:$8 sps:$4 sm:$0xff]   ;;  %v4590_v19 = vld [vmem:[#allocation7 + $0x2d4] ss:$8 sps:$4 sm:$0xff]   ;;  %v1095_v37 = vpack.c.bf16 %v5610_v28, %v5610_v28 }
  0xb1   :  { %2870 = vmatpush1.bf16.msra.mxu1 %v4531_v57  ;;  %2846 = vmatprep.subr.bf16.mxu0 %v4536_v62  ;;  %v1019_v52 = vsel %vm1012_vm5, %v1002_v50, %v792_v41  ;;  %v1093_v57 = vpack.c.bf16 %v5552_v36, %v5552_v36  ;;  %v4569_v62 = vld [vmem:[#allocation7 + $0x314] ss:$8 sps:$4 sm:$0xff]   ;;  %v4570_v36 = vld [vmem:[#allocation7 + $0x2a0] ss:$8 sps:$4 sm:$0xff]   ;;  %v4587_v15 = vld [vmem:[#allocation7 + $0x344] ss:$8 sps:$4 sm:$0xff]  }
  0xb2   :  { %2871 = vmatprep.subr.bf16.mxu1 %v4539_v63  ;;  %v5643_v54 = vsel %vm1029_vm6, %v1019_v52, %v874_v47  ;;  %v1098_v63 = vpack.c.bf16 %v1037_v39, %v1037_v39  ;;  %v4593_v20 = vld [vmem:[#allocation7 + $0x354] ss:$8 sps:$4 sm:$0xff]   ;;  %v4588_v23 = vld [vmem:[#allocation7 + $0x2d0] ss:$8 sps:$4 sm:$0xff]   ;;  %v4599_v21 = vld [vmem:[#allocation7 + $0x364] ss:$8 sps:$4 sm:$0xff]  }
  0xb3   :  { %1080 = vst [vmem:[%s5980_s10 + $0x30] sm:$0xff] %v5643_v54  ;;  %v4594_v29 = vld [vmem:[#allocation7 + $0x2e0] ss:$8 sps:$4 sm:$0xff]   ;;  %v4602_v24 = vld [vmem:[#allocation7 + $0x2f4] ss:$8 sps:$4 sm:$0xff]  }
  0xb4   :  { %2847 = vmatpush1.bf16.msra.mxu0 %v4534_v17  ;;  %v4582_v17 = vld [vmem:[#allocation7 + $0x2c0] ss:$8 sps:$4 sm:$0xff]   ;;  %v4605_v31 = vld [vmem:[#allocation7 + $0x374] ss:$8 sps:$4 sm:$0xff]   ;;  %v4600_v32 = vld [vmem:[#allocation7 + $0x2f0] ss:$8 sps:$4 sm:$0xff]  }
  0xb5   :  { %2872 = vmatpush1.bf16.msra.mxu1 %v4537_v18  ;;  %2848 = vmatprep.subr.bf16.mxu0 %v4542_v25  ;;  %v4585_v18 = vld [vmem:[#allocation7 + $0x340] ss:$8 sps:$4 sm:$0xff]   ;;  %v4591_v25 = vld [vmem:[#allocation7 + $0x350] ss:$8 sps:$4 sm:$0xff]   ;;  %v4611_v27 = vld [vmem:[#allocation7 + $0x404] ss:$8 sps:$4 sm:$0xff]  }
  0xb6   :  { %2873 = vmatprep.subr.bf16.mxu1 %v4545_v26  ;;  %v4596_v26 = vld [vmem:[#allocation7 + $0x2e4] ss:$8 sps:$4 sm:$0xff]   ;;  %v4597_v30 = vld [vmem:[#allocation7 + $0x360] ss:$8 sps:$4 sm:$0xff]   ;;  %v4617_v39 = vld [vmem:[#allocation7 + $0x414] ss:$8 sps:$4 sm:$0xff]  }
  0xb7   :  { %v4606_v40 = vld [vmem:[#allocation7 + $0x380] ss:$8 sps:$4 sm:$0xff]   ;;  %v4612_v41 = vld [vmem:[#allocation7 + $0x390] ss:$8 sps:$4 sm:$0xff]   ;;  %v4620_v47 = vld [vmem:[#allocation7 + $0x3a4] ss:$8 sps:$4 sm:$0xff]  }
  0xb8   :  { %2849 = vmatpush1.bf16.msra.mxu0 %v4540_v33  ;;  %v4603_v33 = vld [vmem:[#allocation7 + $0x370] ss:$8 sps:$4 sm:$0xff]   ;;  %v4623_v44 = vld [vmem:[#allocation7 + $0x424] ss:$8 sps:$4 sm:$0xff]   ;;  %v4618_v28 = vld [vmem:[#allocation7 + $0x3a0] ss:$8 sps:$4 sm:$0xff]  }
  0xb9   :  { %2874 = vmatpush1.bf16.msra.mxu1 %v4543_v35  ;;  %2850 = vmatprep.subr.bf16.mxu0 %v4548_v42  ;;  %v4608_v35 = vld [vmem:[#allocation7 + $0x384] ss:$8 sps:$4 sm:$0xff]   ;;  %v4609_v42 = vld [vmem:[#allocation7 + $0x400] ss:$8 sps:$4 sm:$0xff]   ;;  %v4615_v43 = vld [vmem:[#allocation7 + $0x410] ss:$8 sps:$4 sm:$0xff]  }
  0xba   :  { %2875 = vmatprep.subr.bf16.mxu1 %v4551_v34  ;;  %v4614_v34 = vld [vmem:[#allocation7 + $0x394] ss:$8 sps:$4 sm:$0xff]   ;;  %v4621_v45 = vld [vmem:[#allocation7 + $0x420] ss:$8 sps:$4 sm:$0xff]   ;;  %v4624_v50 = vld [vmem:[#allocation7 + $0x3b0] ss:$8 sps:$4 sm:$0xff]  }
  0xbb   :  { %v4635_v52 = vld [vmem:[#allocation7 + $0x444] ss:$8 sps:$4 sm:$0xff]  }
  0xbc   :  { %2851 = vmatpush1.bf16.msra.mxu0 %v4546_v48  ;;  %v4626_v48 = vld [vmem:[#allocation7 + $0x3b4] ss:$8 sps:$4 sm:$0xff]  }
  0xbd   :  { %2876 = vmatpush1.bf16.msra.mxu1 %v4549_v49  ;;  %2852 = vmatprep.subr.bf16.mxu0 %v4554_v53  ;;  %v4629_v49 = vld [vmem:[#allocation7 + $0x434] ss:$8 sps:$4 sm:$0xff]   ;;  %v4627_v53 = vld [vmem:[#allocation7 + $0x430] ss:$8 sps:$4 sm:$0xff]  }
  0xbe   :  { %2877 = vmatprep.subr.bf16.mxu1 %v4557_v51  ;;  %v4632_v51 = vld [vmem:[#allocation7 + $0x3c4] ss:$8 sps:$4 sm:$0xff]  }
  0xc0   :  { %2853 = vmatpush1.bf16.msra.mxu0 %v4552_v13  ;;  %v3961_v13 = vld [vmem:[%s5356_s25 + $0x40] ss:$8 sm:$0xf] }
  0xc1   :  { %2878 = vmatpush1.bf16.msra.mxu1 %v4555_v55  ;;  %2904 = vmatprep.subr.bf16.mxu0 %v4563_v56  ;;  %v3962_v55 = vld [vmem:[%s5356_s25 + $0x40] ss:$8 sm:$0xf0] }
  0xc2   :  { %2879 = vmatprep.subr.bf16.mxu1 %v4560_v3  ;;  %v3968_v3 = vld [vmem:[%s5363_s0 + $0x40] ss:$8 sm:$0xf]  ;;  %v5656_v56 = vor.u32 %v3962_v55, %v3961_v13 }
  0xc3   :  { %2855 = vmatmul.mubr.bf16.vlgmr.msra.gmra.mrb[4].mxu0 %v1093_v57  ;;  %v3969_v57 = vld [vmem:[%s5363_s0 + $0x40] ss:$8 sm:$0xf0] }
  0xc4   :  { %2905 = vmatpush1.bf16.msra.mxu0 %v4561_v59  ;;  %2936 = vmatprep.mubr.bf16.mxu0 %v1098_v63  ;;  %v4630_v59 = vld [vmem:[#allocation7 + $0x3c0] ss:$8 sps:$4 sm:$0xff]  }
  0xc5   :  { %2880 = vmatpush1.bf16.msra.mxu1 %v4558_v58  ;;  %2906 = vmatprep.subr.bf16.mxu0 %v4569_v62  ;;  %v3975_v58 = vld [vmem:[%s5370_s27 + $0x40] ss:$8 sm:$0xf]  ;;  %v5660_v62 = vor.u32 %v3969_v57, %v3968_v3 }
  0xc6   :  { %2881 = vmatprep.subr.bf16.mxu1 %v4566_v61  ;;  %v4633_v61 = vld [vmem:[#allocation7 + $0x440] ss:$8 sps:$4 sm:$0xff]  }
  0xc7   :  { %v3976_v63 = vld [vmem:[%s5370_s27 + $0x40] ss:$8 sm:$0xf0]  ;;  %v402_v3 = vrot.slane %v5660_v62, %v5351_v11 }
  0xc8   :  { %2907 = vmatpush1.bf16.msra.mxu0 %v4567_v1  ;;  %v4638_v1 = vld [vmem:[#allocation7 + $0x3d4] ss:$8 sps:$4 sm:$0xff]  }
  0xc9   :  { %2882 = vmatpush1.bf16.msra.mxu1 %v4564_v0  ;;  %2908 = vmatprep.subr.bf16.mxu0 %v4575_v4  ;;  %v3982_v0 = vld [vmem:[%s5377_s28 + $0x40] ss:$8 sm:$0xf]  ;;  %v5664_v4 = vor.u32 %v3976_v63, %v3975_v58 }
  0xca   :  { %2883 = vmatprep.subr.bf16.mxu1 %v4572_v2  ;;  %v4641_v2 = vld [vmem:[#allocation7 + $0x454] ss:$8 sps:$4 sm:$0xff]   ;;  %v4645_v58 = vld [vmem:[#allocation7 + $0x460] ss:$8 sps:$4 sm:$0xff]  }
  0xcb   :  { %v484_v57 = vrot.slane %v5664_v4, %v5351_v11 }
  0xcc   :  { %2909 = vmatpush1.bf16.msra.mxu0 %v4573_v5  ;;  %v3989_v5 = vld [vmem:[%s5388_s2 + $0x40] ss:$8 sm:$0xf] }
  0xcd   :  { %2884 = vmatpush1.bf16.msra.mxu1 %v4570_v36  ;;  %2910 = vmatprep.subr.bf16.mxu0 %v4581_v7  ;;  %v3983_v36 = vld [vmem:[%s5377_s28 + $0x40] ss:$8 sm:$0xf0]  ;;  %v308_v7 = vrot.slane %v5656_v56, %v5346_v9 }
  0xce   :  { %2885 = vmatprep.subr.bf16.mxu1 %v4578_v6  ;;  %v312_v6 = vrot.slane %v5656_v56, %v5343_v8 }
  0xd0   :  { %2911 = vmatpush1.bf16.msra.mxu0 %v4579_v12  ;;  %v5674_v12 = vor.u32 %v3983_v36, %v3982_v0  ;;  %v4650_v0 = vld [vmem:[#allocation7 + $0x3f4] ss:$8 sps:$4 sm:$0xff]  }
  0xd1   :  { %2886 = vmatpush1.bf16.msra.mxu1 %v4576_v10  ;;  %2912 = vmatprep.subr.bf16.mxu0 %v4587_v15  ;;  %v320_v10 = vrot.slane %v5656_v56, %v5351_v11  ;;  %v3996_v15 = vld [vmem:[%s5401_s7 + $0x40] ss:$8 sm:$0xf] }
  0xd2   :  { %2887 = vmatprep.subr.bf16.mxu1 %v4584_v14  ;;  %v3990_v14 = vld [vmem:[%s5388_s2 + $0x40] ss:$8 sm:$0xf0]  ;;  %v566_v63 = vrot.slane %v5674_v12, %v5351_v11 }
  0xd4   :  { %2913 = vmatpush1.bf16.msra.mxu0 %v4585_v18  ;;  %v390_v18 = vrot.slane %v5660_v62, %v5346_v9 }
  0xd5   :  { %2888 = vmatpush1.bf16.msra.mxu1 %v4582_v17  ;;  %2914 = vmatprep.subr.bf16.mxu0 %v4593_v20  ;;  %v394_v17 = vrot.slane %v5660_v62, %v5343_v8  ;;  %v3997_v20 = vld [vmem:[%s5401_s7 + $0x40] ss:$8 sm:$0xf0] }
  0xd6   :  { %2889 = vmatprep.subr.bf16.mxu1 %v4590_v19  ;;  %v5682_v19 = vor.u32 %v3990_v14, %v3989_v5  ;;  %v936_v55 = vsel %vm927_vm0, %v308_v7, %v390_v18 }
  0xd8   :  { %2915 = vmatpush1.bf16.msra.mxu0 %v4591_v25  ;;  %v476_v25 = vrot.slane %v5664_v4, %v5343_v8  ;;  %v648_v5 = vrot.slane %v5682_v19, %v5351_v11 }
  0xd9   :  { %2890 = vmatpush1.bf16.msra.mxu1 %v4588_v23  ;;  %2916 = vmatprep.subr.bf16.mxu0 %v4599_v21  ;;  %v4003_v23 = vld [vmem:[%s5414_s13 + $0x40] ss:$8 sm:$0xf]  ;;  %v5690_v21 = vor.u32 %v3997_v20, %v3996_v15  ;;  %v939_v20 = vsel %vm927_vm0, %v320_v10, %v402_v3  ;;  %v4659_v10 = vld [vmem:[#allocation7 + $0x504] ss:$8 sps:$4 sm:$0xff]  }
  0xda   :  { %2891 = vmatprep.subr.bf16.mxu1 %v4596_v26  ;;  %v472_v26 = vrot.slane %v5664_v4, %v5346_v9 }
  0xdb   :  { %v730_v7 = vrot.slane %v5690_v21, %v5351_v11 }
  0xdc   :  { %2917 = vmatpush1.bf16.msra.mxu0 %v4597_v30  ;;  %v4010_v30 = vld [vmem:[%s5444_s26 + $0x40] ss:$8 sm:$0xf] }
  0xdd   :  { %2892 = vmatpush1.bf16.msra.mxu1 %v4594_v29  ;;  %2918 = vmatprep.subr.bf16.mxu0 %v4605_v31  ;;  %v4004_v29 = vld [vmem:[%s5414_s13 + $0x40] ss:$8 sm:$0xf0]  ;;  %v937_v31 = vsel %vm927_vm0, %v312_v6, %v394_v17 }
  0xde   :  { %2893 = vmatprep.subr.bf16.mxu1 %v4602_v24  ;;  %v558_v24 = vrot.slane %v5674_v12, %v5343_v8  ;;  %v4648_v17 = vld [vmem:[#allocation7 + $0x3f0] ss:$8 sps:$4 sm:$0xff]  }
  0xe0   :  { %2919 = vmatpush1.bf16.msra.mxu0 %v4603_v33  ;;  %v4636_v33 = vld [vmem:[#allocation7 + $0x3d0] ss:$8 sps:$4 sm:$0xff]  }
  0xe1   :  { %2894 = vmatpush1.bf16.msra.mxu1 %v4600_v32  ;;  %2920 = vmatprep.subr.bf16.mxu0 %v4608_v35  ;;  %v554_v32 = vrot.slane %v5674_v12, %v5346_v9  ;;  %v5699_v35 = vor.u32 %v4004_v29, %v4003_v23  ;;  %v316_v23 = vrot.slane %v5656_v56, %v5457_v16 }
  0xe2   :  { %2945 = vmatprep.subr.bf16.mxu1 %v4611_v27  ;;  %v4011_v27 = vld [vmem:[%s5444_s26 + $0x40] ss:$8 sm:$0xf0] }
  0xe3   :  { %v812_v14 = vrot.slane %v5699_v35, %v5351_v11 }
  0xe4   :  { %2896 = vmatmul.mubr.bf16.vlgmr.msra.gmra.mrb[4].mxu1 %v1095_v37  ;;  %2921 = vmatpush1.bf16.msra.mxu0 %v4606_v40  ;;  %v640_v37 = vrot.slane %v5682_v19, %v5343_v8  ;;  %v954_v40 = vsel %vm944_vm1, %v937_v31, %v476_v25  ;;  %v398_v25 = vrot.slane %v5660_v62, %v5457_v16  ;;  %v4656_v31 = vld [vmem:[#allocation7 + $0x484] ss:$8 sps:$4 sm:$0xff]  }
  0xe5   :  { %2946 = vmatpush1.bf16.msra.mxu1 %v4609_v42  ;;  %2922 = vmatprep.subr.bf16.mxu0 %v4614_v34  ;;  %v636_v42 = vrot.slane %v5682_v19, %v5346_v9  ;;  %v4639_v34 = vld [vmem:[#allocation7 + $0x450] ss:$8 sps:$4 sm:$0xff]  }
  0xe6   :  { %2947 = vmatprep.subr.bf16.mxu1 %v4617_v39  ;;  %v5707_v39 = vor.u32 %v4011_v27, %v4010_v30  ;;  %v956_v30 = vsel %vm944_vm1, %v939_v20, %v484_v57  ;;  %v562_v27 = vrot.slane %v5674_v12, %v5457_v16  ;;  %v492_v57 = vrot.slane %v5664_v4, %v5484_v38 }
  0xe8   :  { %2923 = vmatpush1.bf16.msra.mxu0 %v4612_v41  ;;  %v722_v41 = vrot.slane %v5690_v21, %v5343_v8  ;;  %v894_v15 = vrot.slane %v5707_v39, %v5351_v11 }
  0xe9   :  { %2948 = vmatpush1.bf16.msra.mxu1 %v4615_v43  ;;  %2924 = vmatprep.subr.bf16.mxu0 %v4620_v47  ;;  %v971_v43 = vsel %vm961_vm2, %v954_v40, %v558_v24  ;;  %v4644_v47 = vld [vmem:[#allocation7 + $0x3e4] ss:$8 sps:$4 sm:$0xff]   ;;  %v480_v24 = vrot.slane %v5664_v4, %v5457_v16 }
  0xea   :  { %2949 = vmatprep.subr.bf16.mxu1 %v4623_v44  ;;  %v4647_v44 = vld [vmem:[#allocation7 + $0x464] ss:$8 sps:$4 sm:$0xff]  }
  0xec   :  { %2925 = vmatpush1.bf16.msra.mxu0 %v4618_v28  ;;  %v804_v28 = vrot.slane %v5699_v35, %v5343_v8 }
  0xed   :  { %2950 = vmatpush1.bf16.msra.mxu1 %v4621_v45  ;;  %2926 = vmatprep.subr.bf16.mxu0 %v4626_v48  ;;  %v988_v45 = vsel %vm978_vm3, %v971_v43, %v640_v37  ;;  %v718_v48 = vrot.slane %v5690_v21, %v5346_v9  ;;  %v1097_v37 = vpack.c.bf16 %v5643_v54, %v5643_v54 }
  0xee   :  { %2951 = vmatprep.subr.bf16.mxu1 %v4629_v49  ;;  %v886_v49 = vrot.slane %v5707_v39, %v5343_v8  ;;  %v890_v54 = vrot.slane %v5707_v39, %v5457_v16 }
  0xf0   :  { %2927 = vmatpush1.bf16.msra.mxu0 %v4624_v50  ;;  %v1005_v50 = vsel %vm995_vm4, %v988_v45, %v722_v41  ;;  %v4654_v41 = vld [vmem:[#allocation7 + $0x480] ss:$8 sps:$4 sm:$0xff]  }
  0xf1   :  { %2952 = vmatpush1.bf16.msra.mxu1 %v4627_v53  ;;  %2928 = vmatprep.subr.bf16.mxu0 %v4632_v51  ;;  %v800_v53 = vrot.slane %v5699_v35, %v5346_v9  ;;  %v882_v51 = vrot.slane %v5707_v39, %v5346_v9  ;;  %v1022_v13 = vsel %vm1012_vm5, %v1005_v50, %v804_v28  ;;  %v4657_v28 = vld [vmem:[#allocation7 + $0x500] ss:$8 sps:$4 sm:$0xff]   ;;  %v4662_v50 = vld [vmem:[#allocation7 + $0x494] ss:$8 sps:$4 sm:$0xff]  }
  0xf2   :  { %2953 = vmatprep.subr.bf16.mxu1 %v4635_v52  ;;  %v4642_v52 = vld [vmem:[#allocation7 + $0x3e0] ss:$8 sps:$4 sm:$0xff]  }
  0xf4   :  { %2929 = vmatpush1.bf16.msra.mxu0 %v4630_v59  ;;  %v1039_v59 = vsel %vm1029_vm6, %v1022_v13, %v886_v49  ;;  %v328_v49 = vrot.slane %v5656_v56, %v5484_v38  ;;  %v410_v13 = vrot.slane %v5660_v62, %v5484_v38 }
  0xf5   :  { %2954 = vmatpush1.bf16.msra.mxu1 %v4633_v61  ;;  %2930 = vmatprep.subr.bf16.mxu0 %v4638_v1  ;;  %v953_v61 = vsel %vm944_vm1, %v936_v55, %v472_v26  ;;  %v4653_v1 = vld [vmem:[#allocation7 + $0x474] ss:$8 sps:$4 sm:$0xff]   ;;  %1083 = vst [vmem:[%s5980_s10 + $0x48] sm:$0xff] %v1039_v59  ;;  %v4651_v26 = vld [vmem:[#allocation7 + $0x470] ss:$8 sps:$4 sm:$0xff]  }
  0xf6   :  { %2955 = vmatprep.subr.bf16.mxu1 %v4641_v2  ;;  %v1100_v2 = vpack.c.bf16 %v1039_v59, %v1039_v59  ;;  %v970_v36 = vsel %vm961_vm2, %v953_v61, %v554_v32  ;;  %v4660_v59 = vld [vmem:[#allocation7 + $0x490] ss:$8 sps:$4 sm:$0xff]  }
  0xf7   :  { %v987_v6 = vsel %vm978_vm3, %v970_v36, %v636_v42  ;;  %v644_v42 = vrot.slane %v5682_v19, %v5457_v16  ;;  %v820_v36 = vrot.slane %v5699_v35, %v5484_v38 }
  0xf8   :  { %2931 = vmatpush1.bf16.msra.mxu0 %v4636_v33  ;;  %2977 = vmatprep.mubr.bf16.mxu1 %v1100_v2  ;;  %v1004_v18 = vsel %vm995_vm4, %v987_v6, %v718_v48  ;;  %v973_v33 = vsel %vm961_vm2, %v956_v30, %v566_v63  ;;  %v656_v63 = vrot.slane %v5682_v19, %v5484_v38  ;;  %v4668_v6 = vld [vmem:[#allocation7 + $0x4a4] ss:$8 sps:$4 sm:$0xff]  }
  0xf9   :  { %2956 = vmatpush1.bf16.msra.mxu1 %v4639_v34  ;;  %2932 = vmatprep.subr.bf16.mxu0 %v4644_v47  ;;  %v1021_v29 = vsel %vm1012_vm5, %v1004_v18, %v800_v53  ;;  %v990_v40 = vsel %vm978_vm3, %v973_v33, %v648_v5  ;;  %v726_v34 = vrot.slane %v5690_v21, %v5457_v16  ;;  %v4665_v53 = vld [vmem:[#allocation7 + $0x514] ss:$8 sps:$4 sm:$0xff]  }
  0xfa   :  { %2957 = vmatprep.subr.bf16.mxu1 %v4647_v44  ;;  %v5761_v32 = vsel %vm1029_vm6, %v1021_v29, %v882_v51  ;;  %v1007_v43 = vsel %vm995_vm4, %v990_v40, %v730_v7  ;;  %v808_v47 = vrot.slane %v5699_v35, %v5457_v16  ;;  %v938_v44 = vsel %vm927_vm0, %v316_v23, %v398_v25  ;;  %v4671_v7 = vld [vmem:[#allocation7 + $0x524] ss:$8 sps:$4 sm:$0xff]   ;;  %v4677_v40 = vld [vmem:[#allocation7 + $0x534] ss:$8 sps:$4 sm:$0xff]  }
  0xfb   :  { %1082 = vst [vmem:[%s5980_s10 + $0x40] sm:$0xff] %v5761_v32  ;;  %v1024_v45 = vsel %vm1012_vm5, %v1007_v43, %v812_v14  ;;  %v955_v48 = vsel %vm944_vm1, %v938_v44, %v480_v24  ;;  %v941_v5 = vsel %vm927_vm0, %v328_v49, %v410_v13  ;;  %v902_v18 = vrot.slane %v5707_v39, %v5484_v38  ;;  %v4680_v13 = vld [vmem:[#allocation7 + $0x4c4] ss:$8 sps:$4 sm:$0xff]  }
  0xfc   :  { %2933 = vmatpush1.bf16.msra.mxu0 %v4642_v52  ;;  %v1041_v51 = vsel %vm1029_vm6, %v1024_v45, %v894_v15  ;;  %v972_v52 = vsel %vm961_vm2, %v955_v48, %v562_v27  ;;  %v958_v15 = vsel %vm944_vm1, %v941_v5, %v492_v57  ;;  %v406_v23 = vrot.slane %v5660_v62, %v5510_v60 }
  0xfd   :  { %2958 = vmatpush1.bf16.msra.mxu1 %v4645_v58  ;;  %2934 = vmatprep.subr.bf16.mxu0 %v4650_v0  ;;  %1085 = vst [vmem:[%s5980_s10 + $0x58] sm:$0xff] %v1041_v51  ;;  %v1102_v55 = vpack.c.bf16 %v1041_v51, %v1041_v51  ;;  %v989_v3 = vsel %vm978_vm3, %v972_v52, %v644_v42 }
  0xfe   :  { %2959 = vmatprep.subr.bf16.mxu1 %v4653_v1  ;;  %v574_v58 = vrot.slane %v5674_v12, %v5484_v38  ;;  %v1006_v61 = vsel %vm995_vm4, %v989_v3, %v726_v34  ;;  %v738_v0 = vrot.slane %v5690_v21, %v5484_v38  ;;  %v4663_v1 = vld [vmem:[#allocation7 + $0x510] ss:$8 sps:$4 sm:$0xff]   ;;  %v488_v25 = vrot.slane %v5664_v4, %v5510_v60 }
  0xff   :  { %v1023_v2 = vsel %vm1012_vm5, %v1006_v61, %v808_v47  ;;  %v570_v30 = vrot.slane %v5674_v12, %v5510_v60  ;;  %v652_v24 = vrot.slane %v5682_v19, %v5510_v60  ;;  %v734_v33 = vrot.slane %v5690_v21, %v5510_v60 }
 0x100   :  { %2935 = vmatpush1.bf16.msra.mxu0 %v4648_v17  ;;  %v5809_v14 = vsel %vm1029_vm6, %v1023_v2, %v890_v54  ;;  %v324_v17 = vrot.slane %v5656_v56, %v5510_v60  ;;  %v975_v20 = vsel %vm961_vm2, %v958_v15, %v574_v58  ;;  %v816_v27 = vrot.slane %v5699_v35, %v5510_v60  ;;  %v4689_v15 = vld [vmem:[#allocation7 + $0x554] ss:$8 sps:$4 sm:$0xff]  }
 0x101   :  { %2960 = vmatpush1.bf16.msra.mxu1 %v4651_v26  ;;  %2986 = vmatprep.subr.bf16.mxu0 %v4659_v10  ;;  %1084 = vst [vmem:[%s5980_s10 + $0x50] sm:$0xff] %v5809_v14  ;;  %v4666_v26 = vld [vmem:[#allocation7 + $0x4a0] ss:$8 sps:$4 sm:$0xff]   ;;  %v992_v29 = vsel %vm978_vm3, %v975_v20, %v656_v63  ;;  %v418_v54 = vrot.slane %v5660_v62, %v5537_v22 }
 0x102   :  { %2961 = vmatprep.subr.bf16.mxu1 %v4656_v31  ;;  %v4669_v31 = vld [vmem:[#allocation7 + $0x520] ss:$8 sps:$4 sm:$0xff]   ;;  %v1009_v10 = vsel %vm995_vm4, %v992_v29, %v738_v0  ;;  %v940_v34 = vsel %vm927_vm0, %v324_v17, %v406_v23  ;;  %v500_v44 = vrot.slane %v5664_v4, %v5537_v22  ;;  %v898_v45 = vrot.slane %v5707_v39, %v5510_v60 }
 0x103   :  { %2937 = vmatmul.mubr.bf16.vlgmr.msra.gmra.mrb[8].mxu0 %v1097_v37  ;;  %v4674_v37 = vld [vmem:[#allocation7 + $0x4b4] ss:$8 sps:$4 sm:$0xff]   ;;  %v1026_v42 = vsel %vm1012_vm5, %v1009_v10, %v820_v36  ;;  %v957_v47 = vsel %vm944_vm1, %v940_v34, %v488_v25  ;;  %v582_v49 = vrot.slane %v5674_v12, %v5537_v22  ;;  %v664_v51 = vrot.slane %v5682_v19, %v5537_v22  ;;  %v4684_v25 = vld [vmem:[#allocation7 + $0x4d0] ss:$8 sps:$4 sm:$0xff]  }
 0x104   :  { %2987 = vmatpush1.bf16.msra.mxu0 %v4657_v28  ;;  %3018 = vmatprep.mubr.bf16.mxu0 %v1102_v55  ;;  %v5840_v43 = vsel %vm1029_vm6, %v1026_v42, %v902_v18  ;;  %v4672_v28 = vld [vmem:[#allocation7 + $0x4b0] ss:$8 sps:$4 sm:$0xff]   ;;  %v974_v48 = vsel %vm961_vm2, %v957_v47, %v570_v30  ;;  %v746_v52 = vrot.slane %v5690_v21, %v5537_v22  ;;  %v4683_v55 = vld [vmem:[#allocation7 + $0x544] ss:$8 sps:$4 sm:$0xff]  }
 0x105   :  { %2962 = vmatpush1.bf16.msra.mxu1 %v4654_v41  ;;  %2988 = vmatprep.subr.bf16.mxu0 %v4665_v53  ;;  %v336_v41 = vrot.slane %v5656_v56, %v5537_v22  ;;  %1087 = vst [vmem:[%s5980_s10 + $0x68] sm:$0xff] %v5840_v43  ;;  %v991_v53 = vsel %vm978_vm3, %v974_v48, %v652_v24  ;;  %v4687_v30 = vld [vmem:[#allocation7 + $0x550] ss:$8 sps:$4 sm:$0xff]   ;;  %v4692_v24 = vld [vmem:[#allocation7 + $0x4e4] ss:$8 sps:$4 sm:$0xff]  }
 0x106   :  { %2963 = vmatprep.subr.bf16.mxu1 %v4662_v50  ;;  %v4675_v50 = vld [vmem:[#allocation7 + $0x530] ss:$8 sps:$4 sm:$0xff]   ;;  %v1008_v3 = vsel %vm995_vm4, %v991_v53, %v734_v33  ;;  %v828_v57 = vrot.slane %v5699_v35, %v5537_v22  ;;  %v332_v63 = vrot.slane %v5656_v56, %v5567_v46  ;;  %v414_v0 = vrot.slane %v5660_v62, %v5567_v46  ;;  %v4690_v33 = vld [vmem:[#allocation7 + $0x4e0] ss:$8 sps:$4 sm:$0xff]   ;;  %v4707_v47 = vld [vmem:[#allocation7 + $0x604] ss:$8 sps:$4 sm:$0xff]  }
 0x107   :  { %v943_v58 = vsel %vm927_vm0, %v336_v41, %v418_v54  ;;  %v910_v36 = vrot.slane %v5707_v39, %v5537_v22  ;;  %v578_v62 = vrot.slane %v5674_v12, %v5567_v46  ;;  %v4686_v22 = vld [vmem:[#allocation7 + $0x4d4] ss:$8 sps:$4 sm:$0xff]   ;;  %v742_v20 = vrot.slane %v5690_v21, %v5567_v46  ;;  %v4696_v42 = vld [vmem:[#allocation7 + $0x4f0] ss:$8 sps:$4 sm:$0xff]   ;;  %v4704_v41 = vld [vmem:[#allocation7 + $0x584] ss:$8 sps:$4 sm:$0xff]  }
 0x108   :  { %2989 = vmatpush1.bf16.msra.mxu0 %v4663_v1  ;;  %v960_v61 = vsel %vm944_vm1, %v943_v58, %v500_v44  ;;  %v4678_v1 = vld [vmem:[#allocation7 + $0x4c0] ss:$8 sps:$4 sm:$0xff]   ;;  %v942_v23 = vsel %vm927_vm0, %v332_v63, %v414_v0  ;;  %v824_v12 = vrot.slane %v5699_v35, %v5567_v46  ;;  %v4699_v34 = vld [vmem:[#allocation7 + $0x570] ss:$8 sps:$4 sm:$0xff]   ;;  %v1099_v54 = vpack.c.bf16 %v5761_v32, %v5761_v32  ;;  %v4713_v48 = vld [vmem:[#allocation7 + $0x614] ss:$8 sps:$4 sm:$0xff]  }
 0x109   :  { %2964 = vmatpush1.bf16.msra.mxu1 %v4660_v59  ;;  %2990 = vmatprep.subr.bf16.mxu0 %v4671_v7  ;;  %v1025_v59 = vsel %vm1012_vm5, %v1008_v3, %v816_v27  ;;  %v977_v5 = vsel %vm961_vm2, %v960_v61, %v582_v49  ;;  %v4681_v7 = vld [vmem:[#allocation7 + $0x540] ss:$8 sps:$4 sm:$0xff]   ;;  %v1104_v49 = vpack.c.bf16 %v5840_v43, %v5840_v43  ;;  %v4711_v53 = vld [vmem:[#allocation7 + $0x610] ss:$8 sps:$4 sm:$0xff]   ;;  %v4719_v32 = vld [vmem:[#allocation7 + $0x624] ss:$8 sps:$4 sm:$0xff]  }
 0x10a   :  { %2965 = vmatprep.subr.bf16.mxu1 %v4668_v6  ;;  %v5872_v2 = vsel %vm1029_vm6, %v1025_v59, %v898_v45  ;;  %v496_v6 = vrot.slane %v5664_v4, %v5567_v46  ;;  %v994_v56 = vsel %vm978_vm3, %v977_v5, %v664_v51  ;;  %v660_v4 = vrot.slane %v5682_v19, %v5567_v46  ;;  %v4702_v44 = vld [vmem:[#allocation7 + $0x580] ss:$8 sps:$4 sm:$0xff]   ;;  %v4710_v45 = vld [vmem:[#allocation7 + $0x594] ss:$8 sps:$4 sm:$0xff]   ;;  %v4716_v51 = vld [vmem:[#allocation7 + $0x5a4] ss:$8 sps:$4 sm:$0xff]  }
 0x10b   :  { %1086 = vst [vmem:[%s5980_s10 + $0x60] sm:$0xff] %v5872_v2  ;;  %v1011_v17 = vsel %vm995_vm4, %v994_v56, %v746_v52  ;;  %v906_v19 = vrot.slane %v5707_v39, %v5567_v46  ;;  %v4698_v46 = vld [vmem:[#allocation7 + $0x4f4] ss:$8 sps:$4 sm:$0xff]   ;;  %v4714_v52 = vld [vmem:[#allocation7 + $0x5a0] ss:$8 sps:$4 sm:$0xff]  }
 0x10c   :  { %2991 = vmatpush1.bf16.msra.mxu0 %v4669_v31  ;;  %v1028_v18 = vsel %vm1012_vm5, %v1011_v17, %v828_v57  ;;  %v959_v29 = vsel %vm944_vm1, %v942_v23, %v496_v6  ;;  %v4695_v31 = vld [vmem:[#allocation7 + $0x564] ss:$8 sps:$4 sm:$0xff]   ;;  %v4701_v39 = vld [vmem:[#allocation7 + $0x574] ss:$8 sps:$4 sm:$0xff]   ;;  %v4720_v57 = vld [vmem:[#allocation7 + $0x5b0] ss:$8 sps:$4 sm:$0xff]  }
 0x10d   :  { %2966 = vmatpush1.bf16.msra.mxu1 %v4666_v26  ;;  %2992 = vmatprep.subr.bf16.mxu0 %v4677_v40  ;;  %v5894_v26 = vsel %vm1029_vm6, %v1028_v18, %v910_v36  ;;  %v976_v21 = vsel %vm961_vm2, %v959_v29, %v578_v62  ;;  %v4725_v3 = vld [vmem:[#allocation7 + $0x634] ss:$8 sps:$4 sm:$0xff]   ;;  %v4723_v43 = vld [vmem:[#allocation7 + $0x630] ss:$8 sps:$4 sm:$0xff]   ;;  %v4728_v58 = vld [vmem:[#allocation7 + $0x5c4] ss:$8 sps:$4 sm:$0xff]  }
 0x10e   :  { %2967 = vmatprep.subr.bf16.mxu1 %v4674_v37  ;;  %1089 = vst [vmem:[%s5980_s10 + $0x78] sm:$0xff] %v5894_v26  ;;  %v993_v35 = vsel %vm978_vm3, %v976_v21, %v660_v4  ;;  %v4693_v37 = vld [vmem:[#allocation7 + $0x560] ss:$8 sps:$4 sm:$0xff]   ;;  %v4731_v59 = vld [vmem:[#allocation7 + $0x644] ss:$8 sps:$4 sm:$0xff]  }
 0x10f   :  { %v1010_v10 = vsel %vm995_vm4, %v993_v35, %v742_v20  ;;  %v4726_v61 = vld [vmem:[#allocation7 + $0x5c0] ss:$8 sps:$4 sm:$0xff]   ;;  %v4734_v0 = vld [vmem:[#allocation7 + $0x5d4] ss:$8 sps:$4 sm:$0xff]   ;;  %v4732_v36 = vld [vmem:[#allocation7 + $0x5d0] ss:$8 sps:$4 sm:$0xff]  }
 0x110   :  { %2993 = vmatpush1.bf16.msra.mxu0 %v4675_v50  ;;  %v1027_v27 = vsel %vm1012_vm5, %v1010_v10, %v824_v12  ;;  %v4708_v50 = vld [vmem:[#allocation7 + $0x590] ss:$8 sps:$4 sm:$0xff]   ;;  %v4729_v63 = vld [vmem:[#allocation7 + $0x640] ss:$8 sps:$4 sm:$0xff]   ;;  %v4740_v6 = vld [vmem:[#allocation7 + $0x5e4] ss:$8 sps:$4 sm:$0xff]   ;;  %v1101_v12 = vpack.c.bf16 %v5809_v14, %v5809_v14 }
 0x111   :  { %2968 = vmatpush1.bf16.msra.mxu1 %v4672_v28  ;;  %2994 = vmatprep.subr.bf16.mxu0 %v4683_v55  ;;  %v5910_v40 = vsel %vm1029_vm6, %v1027_v27, %v906_v19  ;;  %v4705_v28 = vld [vmem:[#allocation7 + $0x600] ss:$8 sps:$4 sm:$0xff]   ;;  %v4722_v55 = vld [vmem:[#allocation7 + $0x5b4] ss:$8 sps:$4 sm:$0xff]   ;;  %v4735_v5 = vld [vmem:[#allocation7 + $0x650] ss:$8 sps:$4 sm:$0xff]  }
 0x112   :  { %2969 = vmatprep.subr.bf16.mxu1 %v4680_v13  ;;  %1088 = vst [vmem:[%s5980_s10 + $0x70] sm:$0xff] %v5910_v40  ;;  %v4717_v13 = vld [vmem:[#allocation7 + $0x620] ss:$8 sps:$4 sm:$0xff]   ;;  %v4744_v17 = vld [vmem:[#allocation7 + $0x5f0] ss:$8 sps:$4 sm:$0xff]  }
 0x113   :  { %v4738_v56 = vld [vmem:[#allocation7 + $0x5e0] ss:$8 sps:$4 sm:$0xff]   ;;  %v4747_v4 = vld [vmem:[#allocation7 + $0x670] ss:$8 sps:$4 sm:$0xff]   ;;  %v4752_v18 = vld [vmem:[#allocation7 + $0x684] ss:$8 sps:$4 sm:$0xff]  }
 0x114   :  { %2995 = vmatpush1.bf16.msra.mxu0 %v4681_v7  ;;  %v4743_v7 = vld [vmem:[#allocation7 + $0x664] ss:$8 sps:$4 sm:$0xff]   ;;  %v4741_v62 = vld [vmem:[#allocation7 + $0x660] ss:$8 sps:$4 sm:$0xff]   ;;  %v4758_v29 = vld [vmem:[#allocation7 + $0x694] ss:$8 sps:$4 sm:$0xff]  }
 0x115   :  { %2970 = vmatpush1.bf16.msra.mxu1 %v4678_v1  ;;  %2996 = vmatprep.subr.bf16.mxu0 %v4689_v15  ;;  %v4737_v1 = vld [vmem:[#allocation7 + $0x654] ss:$8 sps:$4 sm:$0xff]   ;;  %v4755_v20 = vld [vmem:[#allocation7 + $0x704] ss:$8 sps:$4 sm:$0xff]   ;;  %v4750_v23 = vld [vmem:[#allocation7 + $0x680] ss:$8 sps:$4 sm:$0xff]  }
 0x116   :  { %2971 = vmatprep.subr.bf16.mxu1 %v4686_v22  ;;  %v4746_v22 = vld [vmem:[#allocation7 + $0x5f4] ss:$8 sps:$4 sm:$0xff]   ;;  %v4756_v19 = vld [vmem:[#allocation7 + $0x690] ss:$8 sps:$4 sm:$0xff]   ;;  %v4767_v35 = vld [vmem:[#allocation7 + $0x724] ss:$8 sps:$4 sm:$0xff]  }
 0x117   :  { %v4749_v15 = vld [vmem:[#allocation7 + $0x674] ss:$8 sps:$4 sm:$0xff]   ;;  %v4759_v21 = vld [vmem:[#allocation7 + $0x710] ss:$8 sps:$4 sm:$0xff]   ;;  %v4762_v14 = vld [vmem:[#allocation7 + $0x6a0] ss:$8 sps:$4 sm:$0xff]  }
 0x118   :  { %2997 = vmatpush1.bf16.msra.mxu0 %v4687_v30  ;;  %v4761_v30 = vld [vmem:[#allocation7 + $0x714] ss:$8 sps:$4 sm:$0xff]   ;;  %v4765_v10 = vld [vmem:[#allocation7 + $0x720] ss:$8 sps:$4 sm:$0xff]  }
 0x119   :  { %2972 = vmatpush1.bf16.msra.mxu1 %v4684_v25  ;;  %2998 = vmatprep.subr.bf16.mxu0 %v4695_v31  ;;  %v4753_v25 = vld [vmem:[#allocation7 + $0x700] ss:$8 sps:$4 sm:$0xff]   ;;  %v4764_v31 = vld [vmem:[#allocation7 + $0x6a4] ss:$8 sps:$4 sm:$0xff]   ;;  %v4773_v27 = vld [vmem:[#allocation7 + $0x734] ss:$8 sps:$4 sm:$0xff]  }
 0x11a   :  { %2973 = vmatprep.subr.bf16.mxu1 %v4692_v24  ;;  %v1106_v24 = vpack.c.bf16 %v5894_v26, %v5894_v26  ;;  %v4771_v26 = vld [vmem:[#allocation7 + $0x730] ss:$8 sps:$4 sm:$0xff]  }
 0x11c   :  { %2999 = vmatpush1.bf16.msra.mxu0 %v4693_v37  ;;  %v4768_v37 = vld [vmem:[#allocation7 + $0x6b0] ss:$8 sps:$4 sm:$0xff]  }
 0x11d   :  { %2974 = vmatpush1.bf16.msra.mxu1 %v4690_v33  ;;  %3000 = vmatprep.subr.bf16.mxu0 %v4701_v39  ;;  %v4770_v33 = vld [vmem:[#allocation7 + $0x6b4] ss:$8 sps:$4 sm:$0xff]   ;;  %v4779_v39 = vld [vmem:[#allocation7 + $0x744] ss:$8 sps:$4 sm:$0xff]  }
 0x11e   :  { %2975 = vmatprep.subr.bf16.mxu1 %v4698_v46  ;;  %v4776_v46 = vld [vmem:[#allocation7 + $0x6c4] ss:$8 sps:$4 sm:$0xff]  }
 0x120   :  { %3001 = vmatpush1.bf16.msra.mxu0 %v4699_v34  ;;  %v4777_v34 = vld [vmem:[#allocation7 + $0x740] ss:$8 sps:$4 sm:$0xff]  }
 0x121   :  { %2976 = vmatpush1.bf16.msra.mxu1 %v4696_v42  ;;  %3002 = vmatprep.subr.bf16.mxu0 %v4704_v41  ;;  %v4774_v42 = vld [vmem:[#allocation7 + $0x6c0] ss:$8 sps:$4 sm:$0xff]   ;;  %v4782_v41 = vld [vmem:[#allocation7 + $0x6d4] ss:$8 sps:$4 sm:$0xff]  }
 0x122   :  { %3027 = vmatprep.subr.bf16.mxu1 %v4707_v47  ;;  %v4785_v47 = vld [vmem:[#allocation7 + $0x754] ss:$8 sps:$4 sm:$0xff]  }
 0x124   :  { %2978 = vmatmul.mubr.bf16.vlgmr.msra.gmra.mrb[8].mxu1 %v1099_v54  ;;  %3003 = vmatpush1.bf16.msra.mxu0 %v4702_v44  ;;  %v4780_v54 = vld [vmem:[#allocation7 + $0x6d0] ss:$8 sps:$4 sm:$0xff]  }
 0x125   :  { %3028 = vmatpush1.bf16.msra.mxu1 %v4705_v28  ;;  %3004 = vmatprep.subr.bf16.mxu0 %v4710_v45  ;;  %v4783_v44 = vld [vmem:[#allocation7 + $0x750] ss:$8 sps:$4 sm:$0xff]   ;;  %v4788_v28 = vld [vmem:[#allocation7 + $0x6e4] ss:$8 sps:$4 sm:$0xff]  }
 0x126   :  { %3029 = vmatprep.subr.bf16.mxu1 %v4713_v48  ;;  %3059 = vmatprep.mubr.bf16.mxu1 %v1104_v49  ;;  %v4791_v45 = vld [vmem:[#allocation7 + $0x764] ss:$8 sps:$4 sm:$0xff]  }
 0x128   :  { %3005 = vmatpush1.bf16.msra.mxu0 %v4708_v50 }
 0x129   :  { %3030 = vmatpush1.bf16.msra.mxu1 %v4711_v53  ;;  %3006 = vmatprep.subr.bf16.mxu0 %v4716_v51  ;;  %v4786_v53 = vld [vmem:[#allocation7 + $0x6e0] ss:$8 sps:$4 sm:$0xff]  }
 0x12a   :  { %3031 = vmatprep.subr.bf16.mxu1 %v4719_v32  ;;  %v4789_v51 = vld [vmem:[#allocation7 + $0x760] ss:$8 sps:$4 sm:$0xff]  }
 0x12c   :  { %3007 = vmatpush1.bf16.msra.mxu0 %v4714_v52  ;;  %v4794_v52 = vld [vmem:[#allocation7 + $0x6f4] ss:$8 sps:$4 sm:$0xff]  }
 0x12d   :  { %3032 = vmatpush1.bf16.msra.mxu1 %v4717_v13  ;;  %3008 = vmatprep.subr.bf16.mxu0 %v4722_v55  ;;  %v4797_v13 = vld [vmem:[#allocation7 + $0x774] ss:$8 sps:$4 sm:$0xff]   ;;  %v4792_v55 = vld [vmem:[#allocation7 + $0x6f0] ss:$8 sps:$4 sm:$0xff]  }
 0x12e   :  { %3033 = vmatprep.subr.bf16.mxu1 %v4725_v3  ;;  %v4795_v3 = vld [vmem:[#allocation7 + $0x770] ss:$8 sps:$4 sm:$0xff]  }
 0x130   :  { %3009 = vmatpush1.bf16.msra.mxu0 %v4720_v57  ;;  %v4800_v57 = vld [vmem:[#allocation7 + $0x784] ss:$8 sps:$4 sm:$0xff]  }
 0x131   :  { %3034 = vmatpush1.bf16.msra.mxu1 %v4723_v43  ;;  %3010 = vmatprep.subr.bf16.mxu0 %v4728_v58  ;;  %v1103_v43 = vpack.c.bf16 %v5872_v2, %v5872_v2  ;;  %v4798_v58 = vld [vmem:[#allocation7 + $0x780] ss:$8 sps:$4 sm:$0xff]  }
 0x132   :  { %3035 = vmatprep.subr.bf16.mxu1 %v4731_v59  ;;  %v4803_v59 = vld [vmem:[#allocation7 + $0x794] ss:$8 sps:$4 sm:$0xff]   ;;  %v4810_v2 = vld [vmem:[#allocation7 + $0x7c0] ss:$8 sps:$4 sm:$0xff]  }
 0x134   :  { %3011 = vmatpush1.bf16.msra.mxu0 %v4726_v61  ;;  %v4801_v61 = vld [vmem:[#allocation7 + $0x790] ss:$8 sps:$4 sm:$0xff]  }
 0x135   :  { %3036 = vmatpush1.bf16.msra.mxu1 %v4729_v63  ;;  %3012 = vmatprep.subr.bf16.mxu0 %v4734_v0  ;;  %v4806_v63 = vld [vmem:[#allocation7 + $0x7a4] ss:$8 sps:$4 sm:$0xff]   ;;  %v4804_v0 = vld [vmem:[#allocation7 + $0x7a0] ss:$8 sps:$4 sm:$0xff]  }
 0x136   :  { %3037 = vmatprep.subr.bf16.mxu1 %v4737_v1  ;;  %v4809_v1 = vld [vmem:[#allocation7 + $0x7b4] ss:$8 sps:$4 sm:$0xff]  }
 0x138   :  { %3013 = vmatpush1.bf16.msra.mxu0 %v4732_v36  ;;  %v4807_v36 = vld [vmem:[#allocation7 + $0x7b0] ss:$8 sps:$4 sm:$0xff]  }
 0x139   :  { %3038 = vmatpush1.bf16.msra.mxu1 %v4735_v5  ;;  %3014 = vmatprep.subr.bf16.mxu0 %v4740_v6  ;;  %v4812_v5 = vld [vmem:[#allocation7 + $0x7c4] ss:$8 sps:$4 sm:$0xff]   ;;  %v4815_v6 = vld [vmem:[#allocation7 + $0x7d4] ss:$8 sps:$4 sm:$0xff]  }
 0x13a   :  { %3039 = vmatprep.subr.bf16.mxu1 %v4743_v7  ;;  %v4813_v7 = vld [vmem:[#allocation7 + $0x7d0] ss:$8 sps:$4 sm:$0xff]  }
 0x13c   :  { %3015 = vmatpush1.bf16.msra.mxu0 %v4738_v56  ;;  %v4818_v56 = vld [vmem:[#allocation7 + $0x7e4] ss:$8 sps:$4 sm:$0xff]  }
 0x13d   :  { %3040 = vmatpush1.bf16.msra.mxu1 %v4741_v62  ;;  %3016 = vmatprep.subr.bf16.mxu0 %v4746_v22 }
 0x13e   :  { %3041 = vmatprep.subr.bf16.mxu1 %v4749_v15 }
 0x140   :  { %3017 = vmatpush1.bf16.msra.mxu0 %v4744_v17 }
 0x141   :  { %3042 = vmatpush1.bf16.msra.mxu1 %v4747_v4  ;;  %3068 = vmatprep.subr.bf16.mxu0 %v4755_v20  ;;  %v4816_v4 = vld [vmem:[#allocation7 + $0x7e0] ss:$8 sps:$4 sm:$0xff]   ;;  %v4821_v20 = vld [vmem:[#allocation7 + $0x7f4] ss:$8 sps:$4 sm:$0xff]  }
 0x142   :  { %3043 = vmatprep.subr.bf16.mxu1 %v4752_v18 }
 0x143   :  { %3019 = vmatmul.mubr.bf16.vlgmr.msra.gmra.mrb[12].mxu0 %v1101_v12  ;;  %v1105_v12 = vpack.c.bf16 %v5910_v40, %v5910_v40  ;;  %v4831_v40 = vld [vmem:[#allocation10 + $0x38] ss:$24 sps:$4 sm:$0xff]  }
 0x144   :  { %3069 = vmatpush1.bf16.msra.mxu0 %v4753_v25  ;;  %3100 = vmatprep.mubr.bf16.mxu0 %v1106_v24  ;;  %v4819_v25 = vld [vmem:[#allocation7 + $0x7f0] ss:$8 sps:$4 sm:$0xff]  }
 0x145   :  { %3044 = vmatpush1.bf16.msra.mxu1 %v4750_v23  ;;  %3070 = vmatprep.subr.bf16.mxu0 %v4761_v30 }
 0x146   :  { %3045 = vmatprep.subr.bf16.mxu1 %v4758_v29 }
 0x148   :  { %3071 = vmatpush1.bf16.msra.mxu0 %v4759_v21 }
 0x149   :  { %3046 = vmatpush1.bf16.msra.mxu1 %v4756_v19  ;;  %3072 = vmatprep.subr.bf16.mxu0 %v4767_v35  ;;  %v4822_v35 = vld [vmem:[#allocation10] ss:$24 sps:$4 sm:$0xff]  }
 0x14a   :  { %3047 = vmatprep.subr.bf16.mxu1 %v4764_v31 }
 0x14c   :  { %3073 = vmatpush1.bf16.msra.mxu0 %v4765_v10  ;;  %v4825_v10 = vld [vmem:[#allocation10 + $0x8] ss:$24 sps:$4 sm:$0xff]  }
 0x14d   :  { %3048 = vmatpush1.bf16.msra.mxu1 %v4762_v14  ;;  %3074 = vmatprep.subr.bf16.mxu0 %v4773_v27  ;;  %v4824_v14 = vld [vmem:[#allocation10 + $0x4] ss:$24 sps:$4 sm:$0xff]   ;;  %v4830_v27 = vld [vmem:[#allocation10 + $0x34] ss:$24 sps:$4 sm:$0xff]  }
 0x14e   :  { %3049 = vmatprep.subr.bf16.mxu1 %v4770_v33  ;;  %v4827_v33 = vld [vmem:[#allocation10 + $0xc] ss:$24 sps:$4 sm:$0xff]  }
 0x150   :  { %3075 = vmatpush1.bf16.msra.mxu0 %v4771_v26  ;;  %v4828_v26 = vld [vmem:[#allocation10 + $0x30] ss:$24 sps:$4 sm:$0xff]  }
 0x151   :  { %3050 = vmatpush1.bf16.msra.mxu1 %v4768_v37  ;;  %3076 = vmatprep.subr.bf16.mxu0 %v4779_v39  ;;  %v4833_v37 = vld [vmem:[#allocation10 + $0x3c] ss:$24 sps:$4 sm:$0xff]   ;;  %v4839_v39 = vld [vmem:[#allocation10 + $0x6c] ss:$24 sps:$4 sm:$0xff]  }
 0x152   :  { %3051 = vmatprep.subr.bf16.mxu1 %v4776_v46  ;;  %v4836_v46 = vld [vmem:[#allocation10 + $0x64] ss:$24 sps:$4 sm:$0xff]  }
 0x154   :  { %3077 = vmatpush1.bf16.msra.mxu0 %v4777_v34  ;;  %v4837_v34 = vld [vmem:[#allocation10 + $0x68] ss:$24 sps:$4 sm:$0xff]  }
 0x155   :  { %3052 = vmatpush1.bf16.msra.mxu1 %v4774_v42  ;;  %3078 = vmatprep.subr.bf16.mxu0 %v4785_v47  ;;  %v4834_v42 = vld [vmem:[#allocation10 + $0x60] ss:$24 sps:$4 sm:$0xff]   ;;  %v4845_v47 = vld [vmem:[#allocation10 + $0x9c] ss:$24 sps:$4 sm:$0xff]  }
 0x156   :  { %3053 = vmatprep.subr.bf16.mxu1 %v4782_v41  ;;  %v1494_v48 = vpop.f32.mrb[0].mxu0  ;;  %v4842_v41 = vld [vmem:[#allocation10 + $0x94] ss:$24 sps:$4 sm:$0xff]  }
 0x157   :  { %v1496_v49 = vpop.f32.mrb[1].mxu0 }
 0x158   :  { %v1498_v50 = vpop.f32.mrb[2].mxu0  ;;  %3079 = vmatpush1.bf16.msra.mxu0 %v4783_v44  ;;  %v4843_v44 = vld [vmem:[#allocation10 + $0x98] ss:$24 sps:$4 sm:$0xff]  }
 0x159   :  { %3054 = vmatpush1.bf16.msra.mxu1 %v4780_v54  ;;  %v1499_v32 = vpop.f32.mrb[3].mxu0  ;;  %3080 = vmatprep.subr.bf16.mxu0 %v4791_v45  ;;  %v4840_v54 = vld [vmem:[#allocation10 + $0x90] ss:$24 sps:$4 sm:$0xff]   ;;  %v4851_v45 = vld [vmem:[#allocation10 + $0xcc] ss:$24 sps:$4 sm:$0xff]  }
 0x15a   :  { %3055 = vmatprep.subr.bf16.mxu1 %v4788_v28  ;;  %v4848_v28 = vld [vmem:[#allocation10 + $0xc4] ss:$24 sps:$4 sm:$0xff]   ;;  %v4854_v50 = vld [vmem:[#allocation10 + $0xf4] ss:$24 sps:$4 sm:$0xff]   ;;  %v4855_v32 = vld [vmem:[#allocation10 + $0xf8] ss:$24 sps:$4 sm:$0xff]  }
 0x15c   :  { %3081 = vmatpush1.bf16.msra.mxu0 %v4789_v51  ;;  %v4852_v51 = vld [vmem:[#allocation10 + $0xf0] ss:$24 sps:$4 sm:$0xff]  }
 0x15d   :  { %3056 = vmatpush1.bf16.msra.mxu1 %v4786_v53  ;;  %3082 = vmatprep.subr.bf16.mxu0 %v4797_v13  ;;  %v4857_v53 = vld [vmem:[#allocation10 + $0xfc] ss:$24 sps:$4 sm:$0xff]  }
 0x15e   :  { %3057 = vmatprep.subr.bf16.mxu1 %v4794_v52  ;;  %v4860_v13 = vld [vmem:[#allocation10 + $0x124] ss:$24 sps:$4 sm:$0xff]  }
 0x160   :  { %3083 = vmatpush1.bf16.msra.mxu0 %v4795_v3 }
 0x161   :  { %3058 = vmatpush1.bf16.msra.mxu1 %v4792_v55  ;;  %3084 = vmatprep.subr.bf16.mxu0 %v4800_v57  ;;  %v4858_v57 = vld [vmem:[#allocation10 + $0x120] ss:$24 sps:$4 sm:$0xff]  }
 0x162   :  { %3735 = vmatprep.subr.bf16.mxu1 %v4824_v14  ;;  %v4905_v14 = vld [vmem:[#allocation10 + $0x27c] ss:$24 sps:$4 sm:$0xff]  }
 0x164   :  { %3060 = vmatmul.mubr.bf16.vlgmr.msra.gmra.mrb[12].mxu1 %v1103_v43  ;;  %3085 = vmatpush1.bf16.msra.mxu0 %v4798_v58  ;;  %v4863_v43 = vld [vmem:[#allocation10 + $0x12c] ss:$24 sps:$4 sm:$0xff]  }
 0x165   :  { %3086 = vmatprep.subr.bf16.mxu0 %v4803_v59  ;;  %3736 = vmatpush1.bf16.msra.mxu1 %v4822_v35  ;;  %v4902_v35 = vld [vmem:[#allocation10 + $0x274] ss:$24 sps:$4 sm:$0xff]  }
 0x166   :  { %3737 = vmatprep.subr.bf16.mxu1 %v4830_v27 }
 0x168   :  { %3087 = vmatpush1.bf16.msra.mxu0 %v4801_v61  ;;  %v4861_v61 = vld [vmem:[#allocation10 + $0x128] ss:$24 sps:$4 sm:$0xff]  }
 0x169   :  { %3088 = vmatprep.subr.bf16.mxu0 %v4806_v63  ;;  %3738 = vmatpush1.bf16.msra.mxu1 %v4828_v26 }
 0x16a   :  { %3739 = vmatprep.subr.bf16.mxu1 %v4836_v46  ;;  %v4906_v46 = vld [vmem:[#allocation10 + $0x2a0] ss:$24 sps:$4 sm:$0xff]  }
 0x16c   :  { %3089 = vmatpush1.bf16.msra.mxu0 %v4804_v0  ;;  %v4864_v0 = vld [vmem:[#allocation10 + $0x150] ss:$24 sps:$4 sm:$0xff]  }
 0x16d   :  { %3090 = vmatprep.subr.bf16.mxu0 %v4809_v1  ;;  %3740 = vmatpush1.bf16.msra.mxu1 %v4834_v42  ;;  %v4866_v1 = vld [vmem:[#allocation10 + $0x154] ss:$24 sps:$4 sm:$0xff]  }
 0x16e   :  { %3741 = vmatprep.subr.bf16.mxu1 %v4842_v41  ;;  %v4909_v41 = vld [vmem:[#allocation10 + $0x2a8] ss:$24 sps:$4 sm:$0xff]  }
 0x170   :  { %3091 = vmatpush1.bf16.msra.mxu0 %v4807_v36  ;;  %v4867_v36 = vld [vmem:[#allocation10 + $0x158] ss:$24 sps:$4 sm:$0xff]  }
 0x171   :  { %3092 = vmatprep.subr.bf16.mxu0 %v4812_v5  ;;  %3742 = vmatpush1.bf16.msra.mxu1 %v4840_v54  ;;  %v4869_v5 = vld [vmem:[#allocation10 + $0x15c] ss:$24 sps:$4 sm:$0xff]  }
 0x172   :  { %3743 = vmatprep.subr.bf16.mxu1 %v4848_v28  ;;  %v4914_v54 = vld [vmem:[#allocation10 + $0x2d4] ss:$24 sps:$4 sm:$0xff]  }
 0x173   :  { %v4917_v28 = vld [vmem:[#allocation10 + $0x2dc] ss:$24 sps:$4 sm:$0xff]  }
 0x174   :  { %3093 = vmatpush1.bf16.msra.mxu0 %v4810_v2  ;;  %v4872_v2 = vld [vmem:[#allocation10 + $0x184] ss:$24 sps:$4 sm:$0xff]  }
 0x175   :  { %3094 = vmatprep.subr.bf16.mxu0 %v4815_v6  ;;  %v4875_v6 = vld [vmem:[#allocation10 + $0x18c] ss:$24 sps:$4 sm:$0xff]  }
 0x177   :  { %v2815_v62 = vpop.f32.mrb[0].mxu1 }
 0x178   :  { %v2816_v22 = vadd.f32 %v2815_v62, %v1494_v48  ;;  %v2817_v15 = vpop.f32.mrb[1].mxu1  ;;  %3095 = vmatpush1.bf16.msra.mxu0 %v4813_v7  ;;  %v4846_v48 = vld [vmem:[#allocation10 + $0xc0] ss:$24 sps:$4 sm:$0xff]   ;;  %v4878_v62 = vld [vmem:[#allocation10 + $0x1b4] ss:$24 sps:$4 sm:$0xff]  }
 0x179   :  { %v2818_v17 = vadd.f32 %v2817_v15, %v1496_v49  ;;  %v2819_v18 = vpop.f32.mrb[2].mxu1  ;;  %3096 = vmatprep.subr.bf16.mxu0 %v4818_v56  ;;  %v4849_v49 = vld [vmem:[#allocation10 + $0xc8] ss:$24 sps:$4 sm:$0xff]   ;;  %3744 = vmatpush1.bf16.msra.mxu1 %v4846_v48  ;;  %v4920_v48 = vld [vmem:[#allocation10 + $0x14] ss:$24 sps:$4 sm:$0xff]  }
 0x17a   :  { %v2820_v23 = vpop.f32.mrb[3].mxu1  ;;  %3745 = vmatprep.subr.bf16.mxu1 %v4854_v50  ;;  %v4870_v7 = vld [vmem:[#allocation10 + $0x180] ss:$24 sps:$4 sm:$0xff]   ;;  %v4876_v15 = vld [vmem:[#allocation10 + $0x1b0] ss:$24 sps:$4 sm:$0xff]  }
 0x17b   :  { %v4873_v56 = vld [vmem:[#allocation10 + $0x188] ss:$24 sps:$4 sm:$0xff]   ;;  %v4887_v18 = vld [vmem:[#allocation10 + $0x1ec] ss:$24 sps:$4 sm:$0xff]  }
 0x17c   :  { %3097 = vmatpush1.bf16.msra.mxu0 %v4816_v4  ;;  %v4884_v4 = vld [vmem:[#allocation10 + $0x1e4] ss:$24 sps:$4 sm:$0xff]   ;;  %v4885_v23 = vld [vmem:[#allocation10 + $0x1e8] ss:$24 sps:$4 sm:$0xff]  }
 0x17d   :  { %3098 = vmatprep.subr.bf16.mxu0 %v4821_v20  ;;  %3746 = vmatpush1.bf16.msra.mxu1 %v4852_v51  ;;  %v4882_v20 = vld [vmem:[#allocation10 + $0x1e0] ss:$24 sps:$4 sm:$0xff]  }
 0x17e   :  { %3747 = vmatprep.subr.bf16.mxu1 %v4860_v13 }
 0x180   :  { %3099 = vmatpush1.bf16.msra.mxu0 %v4819_v25  ;;  %v4890_v25 = vld [vmem:[#allocation10 + $0x214] ss:$24 sps:$4 sm:$0xff]  }
 0x181   :  { %3776 = vmatprep.subr.bf16.mxu0 %v4827_v33  ;;  %3748 = vmatpush1.bf16.msra.mxu1 %v4858_v57  ;;  %v4903_v33 = vld [vmem:[#allocation10 + $0x278] ss:$24 sps:$4 sm:$0xff]  }
 0x182   :  { %3749 = vmatprep.subr.bf16.mxu1 %v4866_v1 }
 0x183   :  { %3101 = vmatmul.mubr.bf16.vlgmr.msra.gmra.mrb[16].mxu0 %v1105_v12  ;;  %v4893_v12 = vld [vmem:[#allocation10 + $0x21c] ss:$24 sps:$4 sm:$0xff]  }
 0x184   :  { %3777 = vmatpush1.bf16.msra.mxu0 %v4825_v10  ;;  %v4900_v10 = vld [vmem:[#allocation10 + $0x270] ss:$24 sps:$4 sm:$0xff]  }
 0x185   :  { %3778 = vmatprep.subr.bf16.mxu0 %v4833_v37  ;;  %3750 = vmatpush1.bf16.msra.mxu1 %v4864_v0  ;;  %v4908_v37 = vld [vmem:[#allocation10 + $0x2a4] ss:$24 sps:$4 sm:$0xff]  }
 0x186   :  { %3751 = vmatprep.subr.bf16.mxu1 %v4872_v2 }
 0x188   :  { %3779 = vmatpush1.bf16.msra.mxu0 %v4831_v40 }
 0x189   :  { %3780 = vmatprep.subr.bf16.mxu0 %v4839_v39  ;;  %3752 = vmatpush1.bf16.msra.mxu1 %v4870_v7  ;;  %v4911_v39 = vld [vmem:[#allocation10 + $0x2ac] ss:$24 sps:$4 sm:$0xff]  }
 0x18a   :  { %3753 = vmatprep.subr.bf16.mxu1 %v4878_v62 }
 0x18c   :  { %3781 = vmatpush1.bf16.msra.mxu0 %v4837_v34 }
 0x18d   :  { %3782 = vmatprep.subr.bf16.mxu0 %v4845_v47  ;;  %3754 = vmatpush1.bf16.msra.mxu1 %v4876_v15 }
 0x18e   :  { %3755 = vmatprep.subr.bf16.mxu1 %v4884_v4 }
 0x190   :  { %3783 = vmatpush1.bf16.msra.mxu0 %v4843_v44  ;;  %v4912_v44 = vld [vmem:[#allocation10 + $0x2d0] ss:$24 sps:$4 sm:$0xff]  }
 0x191   :  { %3784 = vmatprep.subr.bf16.mxu0 %v4851_v45  ;;  %3756 = vmatpush1.bf16.msra.mxu1 %v4882_v20  ;;  %v4915_v45 = vld [vmem:[#allocation10 + $0x2d8] ss:$24 sps:$4 sm:$0xff]  }
 0x192   :  { %3757 = vmatprep.subr.bf16.mxu1 %v4890_v25 }
 0x194   :  { %3785 = vmatpush1.bf16.msra.mxu0 %v4849_v49 }
 0x195   :  { %3786 = vmatprep.subr.bf16.mxu0 %v4857_v53 }
 0x196   :  { %v2856_v29 = vpop.f32.mrb[4].mxu0 }
 0x197   :  { %v2857_v30 = vadd.f32 %v2856_v29, %v2816_v22  ;;  %v2858_v19 = vpop.f32.mrb[5].mxu0  ;;  %v4881_v22 = vld [vmem:[#allocation10 + $0x1bc] ss:$24 sps:$4 sm:$0xff]   ;;  %v4888_v29 = vld [vmem:[#allocation10 + $0x210] ss:$24 sps:$4 sm:$0xff]  }
 0x198   :  { %v2859_v21 = vadd.f32 %v2858_v19, %v2818_v17  ;;  %v2860_v24 = vpop.f32.mrb[6].mxu0  ;;  %3787 = vmatpush1.bf16.msra.mxu0 %v4855_v32  ;;  %v4879_v17 = vld [vmem:[#allocation10 + $0x1b8] ss:$24 sps:$4 sm:$0xff]   ;;  %v4896_v19 = vld [vmem:[#allocation10 + $0x244] ss:$24 sps:$4 sm:$0xff]   ;;  %3758 = vmatpush1.bf16.msra.mxu1 %v4888_v29 }
 0x199   :  { %v2861_v31 = vpop.f32.mrb[7].mxu0  ;;  %3788 = vmatprep.subr.bf16.mxu0 %v4863_v43  ;;  %v4894_v24 = vld [vmem:[#allocation10 + $0x240] ss:$24 sps:$4 sm:$0xff]   ;;  %3759 = vmatprep.subr.bf16.mxu1 %v4896_v19 }
 0x19a   :  { %v4897_v31 = vld [vmem:[#allocation10 + $0x248] ss:$24 sps:$4 sm:$0xff]  }
 0x19b   :  { %v4921_v19 = vld [vmem:[#allocation10 + $0x40] ss:$24 sps:$4 sm:$0xff]  }
 0x19c   :  { %3789 = vmatpush1.bf16.msra.mxu0 %v4861_v61  ;;  %3760 = vmatpush1.bf16.msra.mxu1 %v4894_v24  ;;  %v4924_v24 = vld [vmem:[#allocation10 + $0x70] ss:$24 sps:$4 sm:$0xff]  }
 0x19d   :  { %3790 = vmatprep.subr.bf16.mxu0 %v4869_v5  ;;  %3761 = vmatprep.subr.bf16.mxu1 %v4902_v35  ;;  %v3109_v5 = vld [vmem:[%s5976_s6] sm:$0x3] }
 0x19e   :  { %v3114_v2 = vrot.slane %v3109_v5, %v5346_v9  ;;  %v3118_v7 = vrot.slane %v3109_v5, %v5343_v8  ;;  %v4927_v35 = vld [vmem:[#allocation10 + $0xa0] ss:$24 sps:$4 sm:$0xff]  }
 0x1a0   :  { %3791 = vmatpush1.bf16.msra.mxu0 %v4867_v36  ;;  %3762 = vmatpush1.bf16.msra.mxu1 %v4900_v10  ;;  %v4930_v10 = vld [vmem:[#allocation10 + $0xd0] ss:$24 sps:$4 sm:$0xff]  }
 0x1a1   :  { %3792 = vmatprep.subr.bf16.mxu0 %v4875_v6  ;;  %3763 = vmatprep.subr.bf16.mxu1 %v4908_v37  ;;  %v4938_v37 = vld [vmem:[#allocation10 + $0x134] ss:$24 sps:$4 sm:$0xff]  }
 0x1a4   :  { %3793 = vmatpush1.bf16.msra.mxu0 %v4873_v56  ;;  %3764 = vmatpush1.bf16.msra.mxu1 %v4906_v46  ;;  %v4939_v46 = vld [vmem:[#allocation10 + $0x160] ss:$24 sps:$4 sm:$0xff]  }
 0x1a5   :  { %3794 = vmatprep.subr.bf16.mxu0 %v4881_v22  ;;  %3765 = vmatprep.subr.bf16.mxu1 %v4914_v54  ;;  %v4948_v54 = vld [vmem:[#allocation10 + $0x1f0] ss:$24 sps:$4 sm:$0xff]  }
 0x1a8   :  { %3795 = vmatpush1.bf16.msra.mxu0 %v4879_v17  ;;  %3766 = vmatpush1.bf16.msra.mxu1 %v4912_v44  ;;  %v4953_v44 = vld [vmem:[#allocation10 + $0x224] ss:$24 sps:$4 sm:$0xff]  }
 0x1a9   :  { %3796 = vmatprep.subr.bf16.mxu0 %v4887_v18  ;;  %3817 = vmatprep.subr.bf16.mxu1 %v4920_v48  ;;  %v4954_v48 = vld [vmem:[#allocation10 + $0x250] ss:$24 sps:$4 sm:$0xff]  }
 0x1ac   :  { %3797 = vmatpush1.bf16.msra.mxu0 %v4885_v23 }
 0x1ad   :  { %3798 = vmatprep.subr.bf16.mxu0 %v4893_v12  ;;  %v4918_v12 = vld [vmem:[#allocation10 + $0x10] ss:$24 sps:$4 sm:$0xff]  }
 0x1b7   :  { %v2897_v52 = vpop.f32.mrb[4].mxu1 }
 0x1b8   :  { %v5928_v55 = vadd.f32 %v2897_v52, %v2857_v30  ;;  %v2899_v3 = vpop.f32.mrb[5].mxu1  ;;  %v4891_v30 = vld [vmem:[#allocation10 + $0x218] ss:$24 sps:$4 sm:$0xff]  }
 0x1b9   :  { %v5930_v58 = vadd.f32 %v2899_v3, %v2859_v21  ;;  %v2901_v59 = vpop.f32.mrb[6].mxu1  ;;  %v4899_v21 = vld [vmem:[#allocation10 + $0x24c] ss:$24 sps:$4 sm:$0xff]   ;;  %3799 = vmatpush1.bf16.msra.mxu0 %v4891_v30 }
 0x1ba   :  { %v2902_v63 = vpop.f32.mrb[7].mxu1  ;;  %3800 = vmatprep.subr.bf16.mxu0 %v4899_v21  ;;  %v4923_v30 = vld [vmem:[#allocation10 + $0x44] ss:$24 sps:$4 sm:$0xff]   ;;  %v4926_v21 = vld [vmem:[#allocation10 + $0x74] ss:$24 sps:$4 sm:$0xff]  }
 0x1bd   :  { %3801 = vmatpush1.bf16.msra.mxu0 %v4897_v31  ;;  %v4929_v31 = vld [vmem:[#allocation10 + $0xa4] ss:$24 sps:$4 sm:$0xff]  }
 0x1be   :  { %3802 = vmatprep.subr.bf16.mxu0 %v4905_v14  ;;  %v4932_v14 = vld [vmem:[#allocation10 + $0xd4] ss:$24 sps:$4 sm:$0xff]  }
 0x1c1   :  { %3803 = vmatpush1.bf16.msra.mxu0 %v4903_v33  ;;  %v4935_v33 = vld [vmem:[#allocation10 + $0x104] ss:$24 sps:$4 sm:$0xff]  }
 0x1c2   :  { %3804 = vmatprep.subr.bf16.mxu0 %v4911_v39  ;;  %v4944_v39 = vld [vmem:[#allocation10 + $0x194] ss:$24 sps:$4 sm:$0xff]  }
 0x1c5   :  { %3805 = vmatpush1.bf16.msra.mxu0 %v4909_v41  ;;  %v4945_v41 = vld [vmem:[#allocation10 + $0x1c0] ss:$24 sps:$4 sm:$0xff]  }
 0x1c6   :  { %3806 = vmatprep.subr.bf16.mxu0 %v4917_v28  ;;  %v4951_v28 = vld [vmem:[#allocation10 + $0x220] ss:$24 sps:$4 sm:$0xff]  }
 0x1c9   :  { %3807 = vmatpush1.bf16.msra.mxu0 %v4915_v45  ;;  %v4956_v45 = vld [vmem:[#allocation10 + $0x254] ss:$24 sps:$4 sm:$0xff]  }
 0x1d6   :  { %v2938_v27 = vpop.f32.mrb[8].mxu0 }
 0x1d7   :  { %v2939_v26 = vadd.f32 %v2938_v27, %v5928_v55  ;;  %v2940_v40 = vpop.f32.mrb[9].mxu0  ;;  %v4933_v27 = vld [vmem:[#allocation10 + $0x100] ss:$24 sps:$4 sm:$0xff]  }
 0x1d8   :  { %v2941_v42 = vadd.f32 %v2940_v40, %v5930_v58  ;;  %v2942_v34 = vpop.f32.mrb[10].mxu0  ;;  %v4941_v40 = vld [vmem:[#allocation10 + $0x164] ss:$24 sps:$4 sm:$0xff]  }
 0x1d9   :  { %v2943_v47 = vpop.f32.mrb[11].mxu0  ;;  %v4947_v34 = vld [vmem:[#allocation10 + $0x1c4] ss:$24 sps:$4 sm:$0xff]  }
 0x1da   :  { %v4950_v47 = vld [vmem:[#allocation10 + $0x1f4] ss:$24 sps:$4 sm:$0xff]  }
 0x1f7   :  { %v2979_v49 = vpop.f32.mrb[8].mxu1 }
 0x1f8   :  { %v2980_v50 = vadd.f32 %v2979_v49, %v2939_v26  ;;  %v2981_v53 = vpop.f32.mrb[9].mxu1  ;;  %v4936_v26 = vld [vmem:[#allocation10 + $0x130] ss:$24 sps:$4 sm:$0xff]   ;;  %v4959_v49 = vld [vmem:[#allocation10 + $0x284] ss:$24 sps:$4 sm:$0xff]  }
 0x1f9   :  { %v2982_v51 = vadd.f32 %v2981_v53, %v2941_v42  ;;  %v2983_v32 = vpop.f32.mrb[10].mxu1  ;;  %v4942_v42 = vld [vmem:[#allocation10 + $0x190] ss:$24 sps:$4 sm:$0xff]   ;;  %v4962_v53 = vld [vmem:[#allocation10 + $0x2b4] ss:$24 sps:$4 sm:$0xff]  }
 0x1fa   :  { %v2984_v52 = vpop.f32.mrb[11].mxu1  ;;  %v4965_v32 = vld [vmem:[#allocation10 + $0x2e4] ss:$24 sps:$4 sm:$0xff]  }
 0x1fb   :  { %v4963_v52 = vld [vmem:[#allocation10 + $0x2e0] ss:$24 sps:$4 sm:$0xff]  }
 0x216   :  { %v3020_v13 = vpop.f32.mrb[12].mxu0 }
 0x217   :  { %v3021_v55 = vadd.f32 %v3020_v13, %v2980_v50  ;;  %v3022_v3 = vpop.f32.mrb[13].mxu0  ;;  %v4957_v50 = vld [vmem:[#allocation10 + $0x280] ss:$24 sps:$4 sm:$0xff]  }
 0x218   :  { %v3023_v57 = vadd.f32 %v3022_v3, %v2982_v51  ;;  %v3024_v43 = vpop.f32.mrb[14].mxu0  ;;  %v4960_v51 = vld [vmem:[#allocation10 + $0x2b0] ss:$24 sps:$4 sm:$0xff]   ;;  %v3223_v13 = vld [vmem:[%s5978_s8] sm:$0x3f] }
 0x219   :  { %v3025_v58 = vpop.f32.mrb[15].mxu0  ;;  %v3236_v3 = vrot.slane %v3223_v13, %v5457_v16  ;;  %v3240_v43 = vrot.slane %v3223_v13, %v5351_v11 }
 0x237   :  { %v3061_v59 = vpop.f32.mrb[12].mxu1 }
 0x238   :  { %v3062_v61 = vadd.f32 %v3061_v59, %v3021_v55  ;;  %v3063_v63 = vpop.f32.mrb[13].mxu1  ;;  %v3228_v55 = vrot.slane %v3223_v13, %v5346_v9 }
 0x239   :  { %v3064_v0 = vadd.f32 %v3063_v63, %v3023_v57  ;;  %v3065_v1 = vpop.f32.mrb[14].mxu1  ;;  %v3232_v57 = vrot.slane %v3223_v13, %v5343_v8 }
 0x23a   :  { %v3066_v36 = vpop.f32.mrb[15].mxu1 }
 0x256   :  { %v3102_v6 = vpop.f32.mrb[16].mxu0 }
 0x257   :  { %v3103_v56 = vadd.f32 %v3102_v6, %v3062_v61  ;;  %v3104_v62 = vpop.f32.mrb[17].mxu0 }
 0x258   :  { %v3105_v22 = vadd.f32 %v3104_v62, %v3064_v0  ;;  %v3106_v15 = vpop.f32.mrb[18].mxu0  ;;  %v3244_v62 = vrot.slane %v3223_v13, %v5510_v60 }
 0x259   :  { %v3121_v17 = vadd.f32 %v3114_v2, %v3103_v56  ;;  %v3107_v4 = vpop.f32.mrb[19].mxu0 }
 0x25a   :  { %v3122_v18 = vadd.f32 %v3118_v7, %v3105_v22  ;;  %v3248_v22 = vrot.slane %v3223_v13, %v5484_v38 }
 0x25b   :  { %v3123_v20 = vmax.f32 %v3121_v17, 0.0 }
 0x25c   :  { %v3124_v23 = vmax.f32 %v3122_v18, 0.0 }
 0x25d   :  { %v5939_v29 = vpack.c.bf16 %v3123_v20, %v3123_v20 }
 0x25e   :  { %v3126_v25 = vpack.c.bf16 %v3124_v23, %v3124_v23 }
 0x260   :  { %3767 = vmatprep.mubr.bf16.mxu1 %v3126_v25  ;;  %3808 = vmatprep.mubr.bf16.mxu0 %v3126_v25 }
 0x261   :  { %3768 = vmatmul.mubr.bf16.vlgmr.msra.gmra.mrb[16].mxu1 %v5939_v29  ;;  %3809 = vmatmul.mubr.bf16.vlgmr.msra.gmra.mrb[20].mxu0 %v5939_v29 }
 0x262   :  { %3818 = vmatpush1.bf16.msra.mxu1 %v4918_v12  ;;  %3849 = vmatprep.mubr.bf16.mxu1 %v3126_v25 }
 0x263   :  { %3819 = vmatprep.subr.bf16.mxu1 %v4923_v30 }
 0x266   :  { %3820 = vmatpush1.bf16.msra.mxu1 %v4921_v19 }
 0x267   :  { %3821 = vmatprep.subr.bf16.mxu1 %v4926_v21 }
 0x26a   :  { %3822 = vmatpush1.bf16.msra.mxu1 %v4924_v24 }
 0x26b   :  { %3823 = vmatprep.subr.bf16.mxu1 %v4929_v31 }
 0x26e   :  { %3824 = vmatpush1.bf16.msra.mxu1 %v4927_v35 }
 0x26f   :  { %3825 = vmatprep.subr.bf16.mxu1 %v4932_v14 }
 0x272   :  { %3826 = vmatpush1.bf16.msra.mxu1 %v4930_v10 }
 0x273   :  { %3827 = vmatprep.subr.bf16.mxu1 %v4935_v33 }
 0x276   :  { %3828 = vmatpush1.bf16.msra.mxu1 %v4933_v27 }
 0x277   :  { %3829 = vmatprep.subr.bf16.mxu1 %v4938_v37 }
 0x27a   :  { %3830 = vmatpush1.bf16.msra.mxu1 %v4936_v26 }
 0x27b   :  { %3831 = vmatprep.subr.bf16.mxu1 %v4941_v40 }
 0x27e   :  { %3832 = vmatpush1.bf16.msra.mxu1 %v4939_v46 }
 0x27f   :  { %3833 = vmatprep.subr.bf16.mxu1 %v4944_v39 }
 0x282   :  { %3834 = vmatpush1.bf16.msra.mxu1 %v4942_v42 }
 0x283   :  { %3835 = vmatprep.subr.bf16.mxu1 %v4947_v34 }
 0x286   :  { %3836 = vmatpush1.bf16.msra.mxu1 %v4945_v41 }
 0x287   :  { %3837 = vmatprep.subr.bf16.mxu1 %v4950_v47 }
 0x28a   :  { %3838 = vmatpush1.bf16.msra.mxu1 %v4948_v54 }
 0x28b   :  { %3839 = vmatprep.subr.bf16.mxu1 %v4953_v44 }
 0x28e   :  { %3840 = vmatpush1.bf16.msra.mxu1 %v4951_v28 }
 0x28f   :  { %3841 = vmatprep.subr.bf16.mxu1 %v4956_v45 }
 0x292   :  { %3842 = vmatpush1.bf16.msra.mxu1 %v4954_v48 }
 0x293   :  { %3843 = vmatprep.subr.bf16.mxu1 %v4959_v49 }
 0x296   :  { %3844 = vmatpush1.bf16.msra.mxu1 %v4957_v50 }
 0x297   :  { %3845 = vmatprep.subr.bf16.mxu1 %v4962_v53 }
 0x29a   :  { %3846 = vmatpush1.bf16.msra.mxu1 %v4960_v51 }
 0x29b   :  { %3847 = vmatprep.subr.bf16.mxu1 %v4965_v32 }
 0x29e   :  { %3848 = vmatpush1.bf16.msra.mxu1 %v4963_v52 }
 0x2a1   :  { %3850 = vmatmul.mubr.bf16.vlgmr.msra.gmra.mrb[20].mxu1 %v5939_v29 }
 0x334   :  { %v3769_v58 = vpop.f32.mrb[16].mxu1  ;;  %v3810_v59 = vpop.f32.mrb[20].mxu0 }
 0x335   :  { %v3770_v61 = vadd.f32 %v3769_v58, %v3228_v55  ;;  %v3811_v63 = vadd.f32 %v3810_v59, %v3236_v3  ;;  %v3771_v0 = vpop.f32.mrb[17].mxu1  ;;  %v3812_v1 = vpop.f32.mrb[21].mxu0 }
 0x336   :  { %v3772_v36 = vadd.f32 %v3771_v0, %v3232_v57  ;;  %v3813_v5 = vadd.f32 %v3812_v1, %v3240_v43  ;;  %v3773_v2 = vpop.f32.mrb[18].mxu1  ;;  %v3814_v6 = vpop.f32.mrb[22].mxu0 }
 0x337   :  { %4966 = vtanh.f32 %v3770_v61  ;;  %v3774_v7 = vpop.f32.mrb[19].mxu1  ;;  %v3815_v56 = vpop.f32.mrb[23].mxu0 }
 0x338   :  { %4968 = vtanh.f32 %v3811_v63 }
 0x339   :  { %4970 = vtanh.f32 %v3772_v36 }
 0x33a   :  { %4972 = vtanh.f32 %v3813_v5 }
 0x341   :  { %v4967_v9 = vpop.eup %4966 }
 0x342   :  { %v4969_v8 = vpop.eup %4968  ;;  %3864 = vst [vmem:[%s5979_s9] sm:$0xff] %v4967_v9 }
 0x343   :  { %v4971_v11 = vpop.eup %4970  ;;  %3866 = vst [vmem:[%s5979_s9 + $0x10] sm:$0xff] %v4969_v8 }
 0x344   :  { %v4973_v16 = vpop.eup %4972  ;;  %3865 = vst [vmem:[%s5979_s9 + $0x8] sm:$0xff] %v4971_v11 }
 0x345   :  { %3867 = vst [vmem:[%s5979_s9 + $0x18] sm:$0xff] %v4973_v16 }
 0x374   :  { %v3851_v15 = vpop.f32.mrb[20].mxu1 }
 0x375   :  { %v3852_v17 = vadd.f32 %v3851_v15, %v3244_v62  ;;  %v3853_v4 = vpop.f32.mrb[21].mxu1 }
 0x376   :  { %v3854_v18 = vadd.f32 %v3853_v4, %v3248_v22  ;;  %v3855_v20 = vpop.f32.mrb[22].mxu1 }
 0x377   :  { %4974 = vtanh.f32 %v3852_v17  ;;  %v3856_v23 = vpop.f32.mrb[23].mxu1 }
 0x378   :  { %4976 = vtanh.f32 %v3854_v18 }
 0x381   :  { %v4975_v25 = vpop.eup %4974 }
 0x382   :  { %v4977_v12 = vpop.eup %4976  ;;  %3868 = vst [vmem:[%s5979_s9 + $0x20] sm:$0xff] %v4975_v25 }
 0x383   :  { %3869 = vst [vmem:[%s5979_s9 + $0x28] sm:$0xff] %v4977_v12 }
 0x384   :  { %3882 = vsyncpa [#allocation6], 1 }
 0x385   :  { %3883 = vsyncpa [#allocation8], 1 }
 0x386   :  { %3884 = vsyncpa [#allocation11], 1 }

</bundles_post_ra>
